<compile_context>
chip_gen: v6e
topology: v6e:2x2x1
jax: 0.10.0
libtpu: 0.0.40
codegen_flags: <defaults>
</compile_context>

<pallas_src>
import functools

import jax
import jax.numpy as jnp
from jax import lax
from jax.experimental import pallas as pl
from jax.experimental.pallas import tpu as pltpu


# ---------------------------------------------------------------------------
# small helpers
# ---------------------------------------------------------------------------
def _round_up(v, m):
    return (v + m - 1) // m * m


def _cparams():
    return pltpu.CompilerParams(
        dimension_semantics=("parallel",),
        vmem_limit_bytes=32 * 1024 * 1024,
    )


def _prep_w3x3(w_oihw, cin_p, cout_p):
    """OIHW 3x3 weight -> (9, cin_p, cout_p) bf16, tap index t = 3*kh + kw."""
    cout, cin = w_oihw.shape[0], w_oihw.shape[1]
    w = jnp.transpose(w_oihw, (2, 3, 1, 0)).reshape(9, cin, cout)
    w = jnp.pad(w, ((0, 0), (0, cin_p - cin), (0, cout_p - cout)))
    return w.astype(jnp.bfloat16)


def _prep_w1x1(w_oihw, cin_p, cout_p):
    cout, cin = w_oihw.shape[0], w_oihw.shape[1]
    w = jnp.transpose(w_oihw.reshape(cout, cin), (1, 0))
    w = jnp.pad(w, ((0, cin_p - cin), (0, cout_p - cout)))
    return w.astype(jnp.bfloat16)


def _pad_vec(v, cp):
    return jnp.pad(v.astype(jnp.float32), (0, cp - v.shape[0]))


def _bn_scale_shift(part_sum, part_sq, gamma_p, beta_p, count, eps):
    """Fold full-batch stats (from per-tile partials) into y = z*scale + shift."""
    tot = jnp.sum(part_sum, axis=0)          # (1, cp)
    tsq = jnp.sum(part_sq, axis=0)           # (1, cp)
    mean = tot / count
    var = jnp.maximum(tsq / count - mean * mean, 0.0)
    scale = gamma_p.reshape(1, -1) * lax.rsqrt(var + eps)
    shift = beta_p.reshape(1, -1) - mean * scale
    return scale.astype(jnp.float32), shift.astype(jnp.float32)


# ---------------------------------------------------------------------------
# Kernel A: conv1 (3x3, stride folded into tap table) + optional 1x1
#           projection-shortcut conv, emitting per-image BN partial stats.
# ---------------------------------------------------------------------------
def _conv1_kernel(x_ref, w1_ref, *rest, taps, sc_tap, has_proj, ho, wo, cinp, cp):
    if has_proj:
        (wsc_ref, z1_ref, s1_ref, q1_ref,
         zsc_ref, ssc_ref, qsc_ref, xf_ref, acc_ref) = rest
    else:
        z1_ref, s1_ref, q1_ref, xf_ref, acc_ref = rest

    # stage the (phase-stacked, spatially padded) image in f32 once; all tap
    # slices / reshapes then operate on clean f32 layouts.
    xf_ref[...] = x_ref[0].astype(jnp.float32)

    acc_ref[...] = jnp.zeros_like(acc_ref)
    for t, (r0, c0) in enumerate(taps):
        xt = xf_ref[r0:r0 + ho, c0:c0 + wo, :]
        xt = xt.reshape(ho * wo, cinp).astype(jnp.bfloat16)
        acc_ref[...] += jnp.dot(xt, w1_ref[t], preferred_element_type=jnp.float32)

    acc = acc_ref[...]
    z1_ref[...] = acc.reshape(1, ho, wo, cp).astype(z1_ref.dtype)
    # per-tile BN partials, computed next to the MXU accumulate (cheap XLU work)
    s1_ref[...] = jnp.sum(acc, axis=0, keepdims=True).reshape(1, 1, cp)
    q1_ref[...] = jnp.sum(acc * acc, axis=0, keepdims=True).reshape(1, 1, cp)

    if has_proj:
        r0, c0 = sc_tap
        xs = xf_ref[r0:r0 + ho, c0:c0 + wo, :]
        xs = xs.reshape(ho * wo, cinp).astype(jnp.bfloat16)
        asc = jnp.dot(xs, wsc_ref[...], preferred_element_type=jnp.float32)
        zsc_ref[...] = asc.reshape(1, ho, wo, cp).astype(zsc_ref.dtype)
        ssc_ref[...] = jnp.sum(asc, axis=0, keepdims=True).reshape(1, 1, cp)
        qsc_ref[...] = jnp.sum(asc * asc, axis=0, keepdims=True).reshape(1, 1, cp)


def _conv1_call(xph, w1, wsc, *, taps, sc_tap, ho, wo, has_proj):
    n, hph, wph, cinp = xph.shape
    cp = w1.shape[2]
    kern = functools.partial(
        _conv1_kernel, taps=taps, sc_tap=sc_tap, has_proj=has_proj,
        ho=ho, wo=wo, cinp=cinp, cp=cp)

    z_sh = jax.ShapeDtypeStruct((n, ho, wo, cp), jnp.bfloat16)
    s_sh = jax.ShapeDtypeStruct((n, 1, cp), jnp.float32)
    x_spec = pl.BlockSpec((1, hph, wph, cinp), lambda i: (i, 0, 0, 0))
    w1_spec = pl.BlockSpec((9, cinp, cp), lambda i: (0, 0, 0))
    z_spec = pl.BlockSpec((1, ho, wo, cp), lambda i: (i, 0, 0, 0))
    s_spec = pl.BlockSpec((1, 1, cp), lambda i: (i, 0, 0))

    in_specs = [x_spec, w1_spec]
    inputs = [xph, w1]
    out_shape = (z_sh, s_sh, s_sh)
    out_specs = (z_spec, s_spec, s_spec)
    if has_proj:
        in_specs.append(pl.BlockSpec((cinp, cp), lambda i: (0, 0)))
        inputs.append(wsc)
        out_shape = out_shape + (z_sh, s_sh, s_sh)
        out_specs = out_specs + (z_spec, s_spec, s_spec)

    return pl.pallas_call(
        kern,
        out_shape=out_shape,
        grid_spec=pltpu.PrefetchScalarGridSpec(
            num_scalar_prefetch=0,
            grid=(n,),
            in_specs=in_specs,
            out_specs=out_specs,
            scratch_shapes=[
                pltpu.VMEM((hph, wph, cinp), jnp.float32),   # f32 staging of x
                pltpu.VMEM((ho * wo, cp), jnp.float32),      # MXU accumulator
            ]),
        compiler_params=_cparams(),
    )(*inputs)


# ---------------------------------------------------------------------------
# Kernel B: apply bn1 affine + relu in-register, then conv2 (3x3, stride 1)
#           as 9 shifted matmuls on a zero-padded VMEM scratch; emits z2 and
#           per-image BN2 partial stats.  out1 never touches HBM.
# ---------------------------------------------------------------------------
def _conv2_kernel(z1_ref, w2_ref, sc1_ref, sh1_ref,
                  z2_ref, s2_ref, q2_ref,
                  pad_ref, acc_ref, *, ho, wo, cp):
    scale = sc1_ref[...].reshape(1, 1, cp)
    shift = sh1_ref[...].reshape(1, 1, cp)
    out1 = jnp.maximum(z1_ref[0].astype(jnp.float32) * scale + shift, 0.0)

    pad_ref[...] = jnp.zeros_like(pad_ref)
    pad_ref[1:1 + ho, 1:1 + wo, :] = out1

    acc_ref[...] = jnp.zeros_like(acc_ref)
    for kh in range(3):
        for kw in range(3):
            xt = pad_ref[kh:kh + ho, kw:kw + wo, :]
            xt = xt.reshape(ho * wo, cp).astype(jnp.bfloat16)
            acc_ref[...] += jnp.dot(
                xt, w2_ref[3 * kh + kw], preferred_element_type=jnp.float32)

    acc = acc_ref[...]
    z2_ref[...] = acc.reshape(1, ho, wo, cp)
    s2_ref[...] = jnp.sum(acc, axis=0, keepdims=True).reshape(1, 1, cp)
    q2_ref[...] = jnp.sum(acc * acc, axis=0, keepdims=True).reshape(1, 1, cp)


def _conv2_call(z1, w2, scale1, shift1):
    n, ho, wo, cp = z1.shape
    kern = functools.partial(_conv2_kernel, ho=ho, wo=wo, cp=cp)
    return pl.pallas_call(
        kern,
        out_shape=(jax.ShapeDtypeStruct((n, ho, wo, cp), jnp.float32),
                   jax.ShapeDtypeStruct((n, 1, cp), jnp.float32),
                   jax.ShapeDtypeStruct((n, 1, cp), jnp.float32)),
        grid_spec=pltpu.PrefetchScalarGridSpec(
            num_scalar_prefetch=0,
            grid=(n,),
            in_specs=[pl.BlockSpec((1, ho, wo, cp), lambda i: (i, 0, 0, 0)),
                      pl.BlockSpec((9, cp, cp), lambda i: (0, 0, 0)),
                      pl.BlockSpec((1, cp), lambda i: (0, 0)),
                      pl.BlockSpec((1, cp), lambda i: (0, 0))],
            out_specs=(pl.BlockSpec((1, ho, wo, cp), lambda i: (i, 0, 0, 0)),
                       pl.BlockSpec((1, 1, cp), lambda i: (i, 0, 0)),
                       pl.BlockSpec((1, 1, cp), lambda i: (i, 0, 0))),
            scratch_shapes=[
                pltpu.VMEM((ho + 2, wo + 2, cp), jnp.float32),  # padded out1
                pltpu.VMEM((ho * wo, cp), jnp.float32),         # accumulator
            ]),
        compiler_params=_cparams(),
    )(z1, w2, scale1, shift1)


# ---------------------------------------------------------------------------
# Kernel C: final elementwise pass  out = relu(bn2(z2) + bn_sc(shortcut))
# (identity shortcut uses scale=1, shift=0).
# ---------------------------------------------------------------------------
def _finalize_kernel(z2_ref, sc_ref, s2_ref, sh2_ref, ssc_ref, shsc_ref,
                     o_ref, *, cp):
    y = z2_ref[...] * s2_ref[...].reshape(1, 1, 1, cp) \
        + sh2_ref[...].reshape(1, 1, 1, cp)
    s = sc_ref[...].astype(jnp.float32) * ssc_ref[...].reshape(1, 1, 1, cp) \
        + shsc_ref[...].reshape(1, 1, 1, cp)
    o_ref[...] = jnp.maximum(y + s, 0.0)


def _finalize_call(z2, sc, scale2, shift2, scale_sc, shift_sc):
    n, ho, wo, cp = z2.shape
    kern = functools.partial(_finalize_kernel, cp=cp)
    io_spec = pl.BlockSpec((1, ho, wo, cp), lambda i: (i, 0, 0, 0))
    vec_spec = pl.BlockSpec((1, cp), lambda i: (0, 0))
    return pl.pallas_call(
        kern,
        out_shape=jax.ShapeDtypeStruct((n, ho, wo, cp), jnp.float32),
        grid_spec=pltpu.PrefetchScalarGridSpec(
            num_scalar_prefetch=0,
            grid=(n,),
            in_specs=[io_spec, io_spec, vec_spec, vec_spec, vec_spec, vec_spec],
            out_specs=io_spec),
        compiler_params=_cparams(),
    )(z2, sc, scale2, shift2, scale_sc, shift_sc)


# ---------------------------------------------------------------------------
# Parameter init (matches a freshly constructed PyTorch BasicBlock)
# ---------------------------------------------------------------------------
def init_basic_block_params(key, in_planes, planes, stride):
    k1, k2, k3 = jax.random.split(key, 3)

    def conv_init(k, cout, cin, kh, kw):  # kaiming-normal-ish
        fan_in = cin * kh * kw
        return jax.random.normal(k, (cout, cin, kh, kw), jnp.float32) * (2.0 / fan_in) ** 0.5

    params = {
        "stride": stride,
        "conv1_w": conv_init(k1, planes, in_planes, 3, 3),
        "bn1_gamma": jnp.ones((planes,), jnp.float32),
        "bn1_beta": jnp.zeros((planes,), jnp.float32),
        "conv2_w": conv_init(k2, planes, planes, 3, 3),
        "bn2_gamma": jnp.ones((planes,), jnp.float32),
        "bn2_beta": jnp.zeros((planes,), jnp.float32),
    }
    if stride != 1 or in_planes != planes:
        params["sc_w"] = conv_init(k3, planes, in_planes, 1, 1)
        params["sc_gamma"] = jnp.ones((planes,), jnp.float32)
        params["sc_beta"] = jnp.zeros((planes,), jnp.float32)
    return params


# ---------------------------------------------------------------------------
# Forward wrapper
# ---------------------------------------------------------------------------
def basic_block_forward(params, x_nchw, *, eps=1e-5):
    stride = params["stride"]
    assert stride in (1, 2), "only stride 1/2 supported (ResNet-18)"

    conv1_w = params["conv1_w"]
    planes, cin = conv1_w.shape[0], conv1_w.shape[1]
    cp = _round_up(planes, 128)        # lane-dense output channels
    cinp = _round_up(cin, 128)         # lane-dense input channels

    x = jnp.transpose(x_nchw, (0, 2, 3, 1)).astype(jnp.float32)      # NCHW->NHWC
    n, h, w, _ = x.shape
    if stride == 2:
        assert h % 2 == 0 and w % 2 == 0
    ho = (h - 1) // stride + 1
    wo = (w - 1) // stride + 1

    # channel-pad + bf16, then spatial zero-pad for the 3x3 convs
    x_cp = jnp.pad(x, ((0, 0), (0, 0), (0, 0), (0, cinp - cin))).astype(jnp.bfloat16)
    xp = jnp.pad(x_cp, ((0, 0), (1, 1), (1, 1), (0, 0)))             # (n,h+2,w+2,cinp)

    if stride == 1:
        xph = xp
        taps = tuple((kh, kw) for kh in range(3) for kw in range(3))
        sc_tap = (1, 1)                       # x[ho, wo] = xp[ho+1, wo+1]
    else:
        # 4-phase space-to-depth so every tap of the stride-2 conv becomes a
        # plain (unstrided) slice inside the kernel.
        ph = ho + 1
        xph = jnp.concatenate(
            [xp[:, a::2, b::2, :] for a in (0, 1) for b in (0, 1)], axis=1)
        taps = tuple(
            ((2 * (kh % 2) + (kw % 2)) * ph + kh // 2, kw // 2)
            for kh in range(3) for kw in range(3))
        sc_tap = (3 * ph, 0)                  # x[2ho, 2wo] = phase(1,1)[ho, wo]

    w1 = _prep_w3x3(conv1_w, cinp, cp)
    w2 = _prep_w3x3(params["conv2_w"], cp, cp)
    g1 = _pad_vec(params["bn1_gamma"], cp)
    b1 = _pad_vec(params["bn1_beta"], cp)
    g2 = _pad_vec(params["bn2_gamma"], cp)
    b2 = _pad_vec(params["bn2_beta"], cp)

    has_proj = "sc_w" in params
    if has_proj:
        wsc = _prep_w1x1(params["sc_w"], cinp, cp)
        z1, s1, q1, zsc, ssc, qsc = _conv1_call(
            xph, w1, wsc, taps=taps, sc_tap=sc_tap, ho=ho, wo=wo, has_proj=True)
    else:
        z1, s1, q1 = _conv1_call(
            xph, w1, None, taps=taps, sc_tap=sc_tap, ho=ho, wo=wo, has_proj=False)

    m = float(n * ho * wo)
    scale1, shift1 = _bn_scale_shift(s1, q1, g1, b1, m, eps)

    z2, s2, q2 = _conv2_call(z1, w2, scale1, shift1)
    scale2, shift2 = _bn_scale_shift(s2, q2, g2, b2, m, eps)

    if has_proj:
        gsc = _pad_vec(params["sc_gamma"], cp)
        bsc = _pad_vec(params["sc_beta"], cp)
        scale_sc, shift_sc = _bn_scale_shift(ssc, qsc, gsc, bsc, m, eps)
        sc_src = zsc
    else:
        # identity shortcut: sc = x (cinp == cp here)
        scale_sc = jnp.ones((1, cp), jnp.float32)
        shift_sc = jnp.zeros((1, cp), jnp.float32)
        sc_src = x_cp

    out = _finalize_call(z2, sc_src, scale2, shift2, scale_sc, shift_sc)
    out = out[..., :planes]
    return jnp.transpose(out, (0, 3, 1, 2))                         # NHWC->NCHW


# ---------------------------------------------------------------------------
# Pure-JAX f32 reference (lax.conv) for numerical verification
# ---------------------------------------------------------------------------
def _ref_forward(params, x_nchw, eps=1e-5):
    def conv(x, w, stride, pad):
        return lax.conv_general_dilated(
            x, w, (stride, stride), [(pad, pad), (pad, pad)],
            dimension_numbers=("NCHW", "OIHW", "NCHW"))

    def bn(x, g, b):
        mean = jnp.mean(x, axis=(0, 2, 3), keepdims=True)
        var = jnp.mean((x - mean) ** 2, axis=(0, 2, 3), keepdims=True)
        return (x - mean) * lax.rsqrt(var + eps) * g.reshape(1, -1, 1, 1) + b.reshape(1, -1, 1, 1)

    s = params["stride"]
    out = jnp.maximum(bn(conv(x_nchw, params["conv1_w"], s, 1),
                         params["bn1_gamma"], params["bn1_beta"]), 0.0)
    out = bn(conv(out, params["conv2_w"], 1, 1), params["bn2_gamma"], params["bn2_beta"])
    if "sc_w" in params:
        sc = bn(conv(x_nchw, params["sc_w"], s, 0), params["sc_gamma"], params["sc_beta"])
    else:
        sc = x_nchw
    return jnp.maximum(out + sc, 0.0)


# ---------------------------------------------------------------------------
if __name__ == "__main__":
    key = jax.random.PRNGKey(0)
    kx, kp1, kp2 = jax.random.split(key, 3)

    x = jax.random.normal(kx, (2, 4, 16, 16), jnp.float32)

    # tolerance reflects bf16 MXU inputs (reference is pure f32)
    ATOL = RTOL = 5e-2

    # case 1: identity shortcut (in_planes == planes, stride == 1)
    params_id = init_basic_block_params(kp1, in_planes=4, planes=4, stride=1)
    out_id = jax.block_until_ready(basic_block_forward(params_id, x))
    ref_id = _ref_forward(params_id, x)
    assert out_id.shape == (2, 4, 16, 16)
    assert jnp.allclose(out_id, ref_id, atol=ATOL, rtol=RTOL), \
        float(jnp.max(jnp.abs(out_id - ref_id)))

    # case 2: projection shortcut (channel change + stride 2)
    params_pr = init_basic_block_params(kp2, in_planes=4, planes=8, stride=2)
    out_pr = jax.block_until_ready(basic_block_forward(params_pr, x))
    ref_pr = _ref_forward(params_pr, x)
    assert out_pr.shape == (2, 8, 8, 8)
    assert jnp.allclose(out_pr, ref_pr, atol=ATOL, rtol=RTOL), \
        float(jnp.max(jnp.abs(out_pr - ref_pr)))

    print("KERNEL_OK")
</pallas_src>

<mosaic_0001>
module attributes {stable_mosaic.version = 11 : i64} {
  func.func @_conv1_kernel(%arg0: i32, %arg1: memref<1x18x18x128xbf16, #tpu.memory_space<vmem>>, %arg2: memref<9x128x128xbf16, #tpu.memory_space<vmem>>, %arg3: memref<1x16x16x128xbf16, #tpu.memory_space<vmem>>, %arg4: memref<1x1x128xf32, #tpu.memory_space<vmem>>, %arg5: memref<1x1x128xf32, #tpu.memory_space<vmem>>, %arg6: memref<18x18x128xf32, #tpu.memory_space<vmem>>, %arg7: memref<256x128xf32, #tpu.memory_space<vmem>>) attributes {dimension_semantics = [#tpu.dimension_semantics<parallel>], iteration_bounds = array<i64: 2>, scalar_prefetch = 0 : i64, scratch_operands = 2 : i64, tpu.core_type = #tpu.core_type<tc>, window_params = [{transform_indices = @transform_0, window_bounds = array<i64: 1, 18, 18, 128>}, {pipeline_mode = #tpu.pipeline_mode<synchronous>, transform_indices = @transform_1, window_bounds = array<i64: 9, 128, 128>}, {transform_indices = @transform_2, window_bounds = array<i64: 1, 16, 16, 128>}, {transform_indices = @transform_3, window_bounds = array<i64: 1, 1, 128>}, {transform_indices = @transform_4, window_bounds = array<i64: 1, 1, 128>}]} {
    %c0 = arith.constant 0 : index
    %c0_0 = arith.constant 0 : index
    %c0_1 = arith.constant 0 : index
    %c0_2 = arith.constant 0 : index
    %0 = vector.load %arg1[%c0, %c0_0, %c0_1, %c0_2] : memref<1x18x18x128xbf16, #tpu.memory_space<vmem>>, vector<1x18x18x128xbf16>
    %1 = vector.shape_cast %0 : vector<1x18x18x128xbf16> to vector<18x18x128xbf16>
    %2 = arith.extf %1 : vector<18x18x128xbf16> to vector<18x18x128xf32>
    %c0_3 = arith.constant 0 : index
    %c0_4 = arith.constant 0 : index
    %c0_5 = arith.constant 0 : index
    %3 = vector.load %arg6[%c0_3, %c0_4, %c0_5] : memref<18x18x128xf32, #tpu.memory_space<vmem>>, vector<18x18x128xf32>
    tpu.vector_store %arg6[%c0_3, %c0_4, %c0_5], %2 {strides = array<i32>} : memref<18x18x128xf32, #tpu.memory_space<vmem>>, vector<18x18x128xf32>,
    %cst = arith.constant 0.000000e+00 : f32
    %4 = vector.broadcast %cst : f32 to vector<256x128xf32>
    %c0_6 = arith.constant 0 : index
    %c0_7 = arith.constant 0 : index
    %5 = vector.load %arg7[%c0_6, %c0_7] : memref<256x128xf32, #tpu.memory_space<vmem>>, vector<256x128xf32>
    tpu.vector_store %arg7[%c0_6, %c0_7], %4 {strides = array<i32>} : memref<256x128xf32, #tpu.memory_space<vmem>>, vector<256x128xf32>,
    %c0_8 = arith.constant 0 : index
    %c0_9 = arith.constant 0 : index
    %c0_10 = arith.constant 0 : index
    %6 = vector.load %arg6[%c0_8, %c0_9, %c0_10] : memref<18x18x128xf32, #tpu.memory_space<vmem>>, vector<16x16x128xf32>
    %7 = vector.shape_cast %6 : vector<16x16x128xf32> to vector<256x128xf32>
    %8 = arith.truncf %7 : vector<256x128xf32> to vector<256x128xbf16>
    %c0_11 = arith.constant 0 : index
    %c0_12 = arith.constant 0 : index
    %9 = vector.load %arg7[%c0_11, %c0_12] : memref<256x128xf32, #tpu.memory_space<vmem>>, vector<256x128xf32>
    %c0_13 = arith.constant 0 : index
    %c0_14 = arith.constant 0 : index
    %c0_15 = arith.constant 0 : index
    %10 = vector.load %arg2[%c0_13, %c0_14, %c0_15] : memref<9x128x128xbf16, #tpu.memory_space<vmem>>, vector<1x128x128xbf16>
    %11 = vector.shape_cast %10 : vector<1x128x128xbf16> to vector<128x128xbf16>
    %cst_16 = arith.constant dense<0.000000e+00> : vector<256x128xf32>
    %12 = tpu.matmul %8, %11, %cst_16 {dimension_numbers = #tpu.dot_dimension_numbers<[1], [0], [0], [1], [0, 0, 1, 1], [], []>} : vector<256x128xbf16>, vector<128x128xbf16>, vector<256x128xf32> -> vector<256x128xf32>
    %13 = arith.addf %9, %12 : vector<256x128xf32>
    %c0_17 = arith.constant 0 : index
    %c0_18 = arith.constant 0 : index
    %14 = vector.load %arg7[%c0_17, %c0_18] : memref<256x128xf32, #tpu.memory_space<vmem>>, vector<256x128xf32>
    tpu.vector_store %arg7[%c0_17, %c0_18], %13 {strides = array<i32>} : memref<256x128xf32, #tpu.memory_space<vmem>>, vector<256x128xf32>,
    %c0_19 = arith.constant 0 : index
    %c1 = arith.constant 1 : index
    %c0_20 = arith.constant 0 : index
    %15 = vector.load %arg6[%c0_19, %c1, %c0_20] : memref<18x18x128xf32, #tpu.memory_space<vmem>>, vector<16x16x128xf32>
    %16 = vector.shape_cast %15 : vector<16x16x128xf32> to vector<256x128xf32>
    %17 = arith.truncf %16 : vector<256x128xf32> to vector<256x128xbf16>
    %c0_21 = arith.constant 0 : index
    %c0_22 = arith.constant 0 : index
    %18 = vector.load %arg7[%c0_21, %c0_22] : memref<256x128xf32, #tpu.memory_space<vmem>>, vector<256x128xf32>
    %c1_23 = arith.constant 1 : index
    %c0_24 = arith.constant 0 : index
    %c0_25 = arith.constant 0 : index
    %19 = vector.load %arg2[%c1_23, %c0_24, %c0_25] : memref<9x128x128xbf16, #tpu.memory_space<vmem>>, vector<1x128x128xbf16>
    %20 = vector.shape_cast %19 : vector<1x128x128xbf16> to vector<128x128xbf16>
    %cst_26 = arith.constant dense<0.000000e+00> : vector<256x128xf32>
    %21 = tpu.matmul %17, %20, %cst_26 {dimension_numbers = #tpu.dot_dimension_numbers<[1], [0], [0], [1], [0, 0, 1, 1], [], []>} : vector<256x128xbf16>, vector<128x128xbf16>, vector<256x128xf32> -> vector<256x128xf32>
    %22 = arith.addf %18, %21 : vector<256x128xf32>
    %c0_27 = arith.constant 0 : index
    %c0_28 = arith.constant 0 : index
    %23 = vector.load %arg7[%c0_27, %c0_28] : memref<256x128xf32, #tpu.memory_space<vmem>>, vector<256x128xf32>
    tpu.vector_store %arg7[%c0_27, %c0_28], %22 {strides = array<i32>} : memref<256x128xf32, #tpu.memory_space<vmem>>, vector<256x128xf32>,
    %c0_29 = arith.constant 0 : index
    %c2 = arith.constant 2 : index
    %c0_30 = arith.constant 0 : index
    %24 = vector.load %arg6[%c0_29, %c2, %c0_30] : memref<18x18x128xf32, #tpu.memory_space<vmem>>, vector<16x16x128xf32>
    %25 = vector.shape_cast %24 : vector<16x16x128xf32> to vector<256x128xf32>
    %26 = arith.truncf %25 : vector<256x128xf32> to vector<256x128xbf16>
    %c0_31 = arith.constant 0 : index
    %c0_32 = arith.constant 0 : index
    %27 = vector.load %arg7[%c0_31, %c0_32] : memref<256x128xf32, #tpu.memory_space<vmem>>, vector<256x128xf32>
    %c2_33 = arith.constant 2 : index
    %c0_34 = arith.constant 0 : index
    %c0_35 = arith.constant 0 : index
    %28 = vector.load %arg2[%c2_33, %c0_34, %c0_35] : memref<9x128x128xbf16, #tpu.memory_space<vmem>>, vector<1x128x128xbf16>
    %29 = vector.shape_cast %28 : vector<1x128x128xbf16> to vector<128x128xbf16>
    %cst_36 = arith.constant dense<0.000000e+00> : vector<256x128xf32>
    %30 = tpu.matmul %26, %29, %cst_36 {dimension_numbers = #tpu.dot_dimension_numbers<[1], [0], [0], [1], [0, 0, 1, 1], [], []>} : vector<256x128xbf16>, vector<128x128xbf16>, vector<256x128xf32> -> vector<256x128xf32>
    %31 = arith.addf %27, %30 : vector<256x128xf32>
    %c0_37 = arith.constant 0 : index
    %c0_38 = arith.constant 0 : index
    %32 = vector.load %arg7[%c0_37, %c0_38] : memref<256x128xf32, #tpu.memory_space<vmem>>, vector<256x128xf32>
    tpu.vector_store %arg7[%c0_37, %c0_38], %31 {strides = array<i32>} : memref<256x128xf32, #tpu.memory_space<vmem>>, vector<256x128xf32>,
    %c1_39 = arith.constant 1 : index
    %c0_40 = arith.constant 0 : index
    %c0_41 = arith.constant 0 : index
    %33 = vector.load %arg6[%c1_39, %c0_40, %c0_41] : memref<18x18x128xf32, #tpu.memory_space<vmem>>, vector<16x16x128xf32>
    %34 = vector.shape_cast %33 : vector<16x16x128xf32> to vector<256x128xf32>
    %35 = arith.truncf %34 : vector<256x128xf32> to vector<256x128xbf16>
    %c0_42 = arith.constant 0 : index
    %c0_43 = arith.constant 0 : index
    %36 = vector.load %arg7[%c0_42, %c0_43] : memref<256x128xf32, #tpu.memory_space<vmem>>, vector<256x128xf32>
    %c3 = arith.constant 3 : index
    %c0_44 = arith.constant 0 : index
    %c0_45 = arith.constant 0 : index
    %37 = vector.load %arg2[%c3, %c0_44, %c0_45] : memref<9x128x128xbf16, #tpu.memory_space<vmem>>, vector<1x128x128xbf16>
    %38 = vector.shape_cast %37 : vector<1x128x128xbf16> to vector<128x128xbf16>
    %cst_46 = arith.constant dense<0.000000e+00> : vector<256x128xf32>
    %39 = tpu.matmul %35, %38, %cst_46 {dimension_numbers = #tpu.dot_dimension_numbers<[1], [0], [0], [1], [0, 0, 1, 1], [], []>} : vector<256x128xbf16>, vector<128x128xbf16>, vector<256x128xf32> -> vector<256x128xf32>
    %40 = arith.addf %36, %39 : vector<256x128xf32>
    %c0_47 = arith.constant 0 : index
    %c0_48 = arith.constant 0 : index
    %41 = vector.load %arg7[%c0_47, %c0_48] : memref<256x128xf32, #tpu.memory_space<vmem>>, vector<256x128xf32>
    tpu.vector_store %arg7[%c0_47, %c0_48], %40 {strides = array<i32>} : memref<256x128xf32, #tpu.memory_space<vmem>>, vector<256x128xf32>,
    %c1_49 = arith.constant 1 : index
    %c1_50 = arith.constant 1 : index
    %c0_51 = arith.constant 0 : index
    %42 = vector.load %arg6[%c1_49, %c1_50, %c0_51] : memref<18x18x128xf32, #tpu.memory_space<vmem>>, vector<16x16x128xf32>
    %43 = vector.shape_cast %42 : vector<16x16x128xf32> to vector<256x128xf32>
    %44 = arith.truncf %43 : vector<256x128xf32> to vector<256x128xbf16>
    %c0_52 = arith.constant 0 : index
    %c0_53 = arith.constant 0 : index
    %45 = vector.load %arg7[%c0_52, %c0_53] : memref<256x128xf32, #tpu.memory_space<vmem>>, vector<256x128xf32>
    %c4 = arith.constant 4 : index
    %c0_54 = arith.constant 0 : index
    %c0_55 = arith.constant 0 : index
    %46 = vector.load %arg2[%c4, %c0_54, %c0_55] : memref<9x128x128xbf16, #tpu.memory_space<vmem>>, vector<1x128x128xbf16>
    %47 = vector.shape_cast %46 : vector<1x128x128xbf16> to vector<128x128xbf16>
    %cst_56 = arith.constant dense<0.000000e+00> : vector<256x128xf32>
    %48 = tpu.matmul %44, %47, %cst_56 {dimension_numbers = #tpu.dot_dimension_numbers<[1], [0], [0], [1], [0, 0, 1, 1], [], []>} : vector<256x128xbf16>, vector<128x128xbf16>, vector<256x128xf32> -> vector<256x128xf32>
    %49 = arith.addf %45, %48 : vector<256x128xf32>
    %c0_57 = arith.constant 0 : index
    %c0_58 = arith.constant 0 : index
    %50 = vector.load %arg7[%c0_57, %c0_58] : memref<256x128xf32, #tpu.memory_space<vmem>>, vector<256x128xf32>
    tpu.vector_store %arg7[%c0_57, %c0_58], %49 {strides = array<i32>} : memref<256x128xf32, #tpu.memory_space<vmem>>, vector<256x128xf32>,
    %c1_59 = arith.constant 1 : index
    %c2_60 = arith.constant 2 : index
    %c0_61 = arith.constant 0 : index
    %51 = vector.load %arg6[%c1_59, %c2_60, %c0_61] : memref<18x18x128xf32, #tpu.memory_space<vmem>>, vector<16x16x128xf32>
    %52 = vector.shape_cast %51 : vector<16x16x128xf32> to vector<256x128xf32>
    %53 = arith.truncf %52 : vector<256x128xf32> to vector<256x128xbf16>
    %c0_62 = arith.constant 0 : index
    %c0_63 = arith.constant 0 : index
    %54 = vector.load %arg7[%c0_62, %c0_63] : memref<256x128xf32, #tpu.memory_space<vmem>>, vector<256x128xf32>
    %c5 = arith.constant 5 : index
    %c0_64 = arith.constant 0 : index
    %c0_65 = arith.constant 0 : index
    %55 = vector.load %arg2[%c5, %c0_64, %c0_65] : memref<9x128x128xbf16, #tpu.memory_space<vmem>>, vector<1x128x128xbf16>
    %56 = vector.shape_cast %55 : vector<1x128x128xbf16> to vector<128x128xbf16>
    %cst_66 = arith.constant dense<0.000000e+00> : vector<256x128xf32>
    %57 = tpu.matmul %53, %56, %cst_66 {dimension_numbers = #tpu.dot_dimension_numbers<[1], [0], [0], [1], [0, 0, 1, 1], [], []>} : vector<256x128xbf16>, vector<128x128xbf16>, vector<256x128xf32> -> vector<256x128xf32>
    %58 = arith.addf %54, %57 : vector<256x128xf32>
    %c0_67 = arith.constant 0 : index
    %c0_68 = arith.constant 0 : index
    %59 = vector.load %arg7[%c0_67, %c0_68] : memref<256x128xf32, #tpu.memory_space<vmem>>, vector<256x128xf32>
    tpu.vector_store %arg7[%c0_67, %c0_68], %58 {strides = array<i32>} : memref<256x128xf32, #tpu.memory_space<vmem>>, vector<256x128xf32>,
    %c2_69 = arith.constant 2 : index
    %c0_70 = arith.constant 0 : index
    %c0_71 = arith.constant 0 : index
    %60 = vector.load %arg6[%c2_69, %c0_70, %c0_71] : memref<18x18x128xf32, #tpu.memory_space<vmem>>, vector<16x16x128xf32>
    %61 = vector.shape_cast %60 : vector<16x16x128xf32> to vector<256x128xf32>
    %62 = arith.truncf %61 : vector<256x128xf32> to vector<256x128xbf16>
    %c0_72 = arith.constant 0 : index
    %c0_73 = arith.constant 0 : index
    %63 = vector.load %arg7[%c0_72, %c0_73] : memref<256x128xf32, #tpu.memory_space<vmem>>, vector<256x128xf32>
    %c6 = arith.constant 6 : index
    %c0_74 = arith.constant 0 : index
    %c0_75 = arith.constant 0 : index
    %64 = vector.load %arg2[%c6, %c0_74, %c0_75] : memref<9x128x128xbf16, #tpu.memory_space<vmem>>, vector<1x128x128xbf16>
    %65 = vector.shape_cast %64 : vector<1x128x128xbf16> to vector<128x128xbf16>
    %cst_76 = arith.constant dense<0.000000e+00> : vector<256x128xf32>
    %66 = tpu.matmul %62, %65, %cst_76 {dimension_numbers = #tpu.dot_dimension_numbers<[1], [0], [0], [1], [0, 0, 1, 1], [], []>} : vector<256x128xbf16>, vector<128x128xbf16>, vector<256x128xf32> -> vector<256x128xf32>
    %67 = arith.addf %63, %66 : vector<256x128xf32>
    %c0_77 = arith.constant 0 : index
    %c0_78 = arith.constant 0 : index
    %68 = vector.load %arg7[%c0_77, %c0_78] : memref<256x128xf32, #tpu.memory_space<vmem>>, vector<256x128xf32>
    tpu.vector_store %arg7[%c0_77, %c0_78], %67 {strides = array<i32>} : memref<256x128xf32, #tpu.memory_space<vmem>>, vector<256x128xf32>,
    %c2_79 = arith.constant 2 : index
    %c1_80 = arith.constant 1 : index
    %c0_81 = arith.constant 0 : index
    %69 = vector.load %arg6[%c2_79, %c1_80, %c0_81] : memref<18x18x128xf32, #tpu.memory_space<vmem>>, vector<16x16x128xf32>
    %70 = vector.shape_cast %69 : vector<16x16x128xf32> to vector<256x128xf32>
    %71 = arith.truncf %70 : vector<256x128xf32> to vector<256x128xbf16>
    %c0_82 = arith.constant 0 : index
    %c0_83 = arith.constant 0 : index
    %72 = vector.load %arg7[%c0_82, %c0_83] : memref<256x128xf32, #tpu.memory_space<vmem>>, vector<256x128xf32>
    %c7 = arith.constant 7 : index
    %c0_84 = arith.constant 0 : index
    %c0_85 = arith.constant 0 : index
    %73 = vector.load %arg2[%c7, %c0_84, %c0_85] : memref<9x128x128xbf16, #tpu.memory_space<vmem>>, vector<1x128x128xbf16>
    %74 = vector.shape_cast %73 : vector<1x128x128xbf16> to vector<128x128xbf16>
    %cst_86 = arith.constant dense<0.000000e+00> : vector<256x128xf32>
    %75 = tpu.matmul %71, %74, %cst_86 {dimension_numbers = #tpu.dot_dimension_numbers<[1], [0], [0], [1], [0, 0, 1, 1], [], []>} : vector<256x128xbf16>, vector<128x128xbf16>, vector<256x128xf32> -> vector<256x128xf32>
    %76 = arith.addf %72, %75 : vector<256x128xf32>
    %c0_87 = arith.constant 0 : index
    %c0_88 = arith.constant 0 : index
    %77 = vector.load %arg7[%c0_87, %c0_88] : memref<256x128xf32, #tpu.memory_space<vmem>>, vector<256x128xf32>
    tpu.vector_store %arg7[%c0_87, %c0_88], %76 {strides = array<i32>} : memref<256x128xf32, #tpu.memory_space<vmem>>, vector<256x128xf32>,
    %c2_89 = arith.constant 2 : index
    %c2_90 = arith.constant 2 : index
    %c0_91 = arith.constant 0 : index
    %78 = vector.load %arg6[%c2_89, %c2_90, %c0_91] : memref<18x18x128xf32, #tpu.memory_space<vmem>>, vector<16x16x128xf32>
    %79 = vector.shape_cast %78 : vector<16x16x128xf32> to vector<256x128xf32>
    %80 = arith.truncf %79 : vector<256x128xf32> to vector<256x128xbf16>
    %c0_92 = arith.constant 0 : index
    %c0_93 = arith.constant 0 : index
    %81 = vector.load %arg7[%c0_92, %c0_93] : memref<256x128xf32, #tpu.memory_space<vmem>>, vector<256x128xf32>
    %c8 = arith.constant 8 : index
    %c0_94 = arith.constant 0 : index
    %c0_95 = arith.constant 0 : index
    %82 = vector.load %arg2[%c8, %c0_94, %c0_95] : memref<9x128x128xbf16, #tpu.memory_space<vmem>>, vector<1x128x128xbf16>
    %83 = vector.shape_cast %82 : vector<1x128x128xbf16> to vector<128x128xbf16>
    %cst_96 = arith.constant dense<0.000000e+00> : vector<256x128xf32>
    %84 = tpu.matmul %80, %83, %cst_96 {dimension_numbers = #tpu.dot_dimension_numbers<[1], [0], [0], [1], [0, 0, 1, 1], [], []>} : vector<256x128xbf16>, vector<128x128xbf16>, vector<256x128xf32> -> vector<256x128xf32>
    %85 = arith.addf %81, %84 : vector<256x128xf32>
    %c0_97 = arith.constant 0 : index
    %c0_98 = arith.constant 0 : index
    %86 = vector.load %arg7[%c0_97, %c0_98] : memref<256x128xf32, #tpu.memory_space<vmem>>, vector<256x128xf32>
    tpu.vector_store %arg7[%c0_97, %c0_98], %85 {strides = array<i32>} : memref<256x128xf32, #tpu.memory_space<vmem>>, vector<256x128xf32>,
    %c0_99 = arith.constant 0 : index
    %c0_100 = arith.constant 0 : index
    %87 = vector.load %arg7[%c0_99, %c0_100] : memref<256x128xf32, #tpu.memory_space<vmem>>, vector<256x128xf32>
    %88 = vector.shape_cast %87 : vector<256x128xf32> to vector<1x16x16x128xf32>
    %89 = arith.truncf %88 : vector<1x16x16x128xf32> to vector<1x16x16x128xbf16>
    %c0_101 = arith.constant 0 : index
    %c0_102 = arith.constant 0 : index
    %c0_103 = arith.constant 0 : index
    %c0_104 = arith.constant 0 : index
    %90 = vector.load %arg3[%c0_101, %c0_102, %c0_103, %c0_104] : memref<1x16x16x128xbf16, #tpu.memory_space<vmem>>, vector<1x16x16x128xbf16>
    tpu.vector_store %arg3[%c0_101, %c0_102, %c0_103, %c0_104], %89 {strides = array<i32>} : memref<1x16x16x128xbf16, #tpu.memory_space<vmem>>, vector<1x16x16x128xbf16>,
    %cst_105 = arith.constant dense<0.000000e+00> : vector<128xf32>
    %91 = vector.multi_reduction <add>, %87, %cst_105 [0] : vector<256x128xf32> to vector<128xf32>
    %92 = vector.shape_cast %91 : vector<128xf32> to vector<1x128xf32>
    %93 = vector.shape_cast %92 : vector<1x128xf32> to vector<1x1x128xf32>
    %c0_106 = arith.constant 0 : index
    %c0_107 = arith.constant 0 : index
    %c0_108 = arith.constant 0 : index
    %94 = vector.load %arg4[%c0_106, %c0_107, %c0_108] : memref<1x1x128xf32, #tpu.memory_space<vmem>>, vector<1x1x128xf32>
    tpu.vector_store %arg4[%c0_106, %c0_107, %c0_108], %93 {strides = array<i32>} : memref<1x1x128xf32, #tpu.memory_space<vmem>>, vector<1x1x128xf32>,
    %95 = arith.mulf %87, %87 : vector<256x128xf32>
    %cst_109 = arith.constant dense<0.000000e+00> : vector<128xf32>
    %96 = vector.multi_reduction <add>, %95, %cst_109 [0] : vector<256x128xf32> to vector<128xf32>
    %97 = vector.shape_cast %96 : vector<128xf32> to vector<1x128xf32>
    %98 = vector.shape_cast %97 : vector<1x128xf32> to vector<1x1x128xf32>
    %c0_110 = arith.constant 0 : index
    %c0_111 = arith.constant 0 : index
    %c0_112 = arith.constant 0 : index
    %99 = vector.load %arg5[%c0_110, %c0_111, %c0_112] : memref<1x1x128xf32, #tpu.memory_space<vmem>>, vector<1x1x128xf32>
    tpu.vector_store %arg5[%c0_110, %c0_111, %c0_112], %98 {strides = array<i32>} : memref<1x1x128xf32, #tpu.memory_space<vmem>>, vector<1x1x128xf32>,
    return
  }
  func.func @transform_0(%arg0: i32) -> (i32, i32, i32, i32) {
    %c0_i32 = arith.constant 0 : i32
    %c0_i32_0 = arith.constant 0 : i32
    %c0_i32_1 = arith.constant 0 : i32
    %c0_i32_2 = arith.constant 0 : i32
    return %arg0, %c0_i32, %c0_i32_0, %c0_i32_1 : i32, i32, i32, i32
  }
  func.func @transform_1(%arg0: i32) -> (i32, i32, i32) {
    %c0_i32 = arith.constant 0 : i32
    %c0_i32_0 = arith.constant 0 : i32
    %c0_i32_1 = arith.constant 0 : i32
    %c0_i32_2 = arith.constant 0 : i32
    return %c0_i32, %c0_i32_0, %c0_i32_1 : i32, i32, i32
  }
  func.func @transform_2(%arg0: i32) -> (i32, i32, i32, i32) {
    %c0_i32 = arith.constant 0 : i32
    %c0_i32_0 = arith.constant 0 : i32
    %c0_i32_1 = arith.constant 0 : i32
    %c0_i32_2 = arith.constant 0 : i32
    return %arg0, %c0_i32, %c0_i32_0, %c0_i32_1 : i32, i32, i32, i32
  }
  func.func @transform_3(%arg0: i32) -> (i32, i32, i32) {
    %c0_i32 = arith.constant 0 : i32
    %c0_i32_0 = arith.constant 0 : i32
    %c0_i32_1 = arith.constant 0 : i32
    return %arg0, %c0_i32, %c0_i32_0 : i32, i32, i32
  }
  func.func @transform_4(%arg0: i32) -> (i32, i32, i32) {
    %c0_i32 = arith.constant 0 : i32
    %c0_i32_0 = arith.constant 0 : i32
    %c0_i32_1 = arith.constant 0 : i32
    return %arg0, %c0_i32, %c0_i32_0 : i32, i32, i32
  }
}

</mosaic_0001>

<bundles_post_ra>
// kernel: tpu_custom_call.1
= control target key start
LH: loop header
LB: loop body
LE: loop exit
PB: predicated region body
PF: predicated region fallthrough
CT: control target
= control target key end

     0   :  { %10 = vsyncpa [#allocation5], 0  ;;  %s6700_s0 = inlined_call_operand.vmem [shape: bf16[2,18,18,128], index: 0, kind: input, shape index: {}]   ;;  %s6701_s1 = inlined_call_operand.vmem [shape: bf16[9,128,128], index: 1, kind: input, shape index: {}]   ;;  %s6702_s2 = inlined_call_operand.hbm [shape: bf16[2,16,16,128], index: 2, kind: output, shape index: {0}]   ;;  %s6703_s3 = inlined_call_operand.hbm [shape: f32[2,1,128], index: 3, kind: output, shape index: {1}]   ;;  %s6704_s4 = inlined_call_operand.hbm [shape: f32[2,1,128], index: 4, kind: output, shape index: {2}]  }
   0x1   :  { %12 = vsyncpa [#allocation5 + $0x1], 0 }
   0x2   :  { %13 = vsyncpa [#allocation7], 0 }
   0x3   :  { %15 = vsyncpa [#allocation7 + $0x1], 0  ;;  %s5563_s15 = smov 0   ;;  %s5565_s16 = smov 0  }
   0x4   :  { %s5567_s17 = smov 0   ;;  %s5569_s18 = smov 0  }
   0x5 LB: > { %s5584_s19 = sadd.s32 4294967295, %s5531_s18   ;;  %s4201_s20 = sadd.s32 4294967294, %s5531_s18   ;;  %s5531_s18 = sphi %s5569_s18, %s6766_s18   ;;  %s5527_s17 = sphi %s5567_s17, %s6765_s17   ;;  %s5523_s16 = sphi %s5565_s16, %s6764_s16   ;;  %s5519_s15 = sphi %s5563_s15, %s6763_s15  }
   0x6   : > { %s5588_s21 = sadd.s32 1, %s5531_s18   ;;  %s75_s22 = sadd.s32 1, %s5527_s17 }
   0x7   : > { %s72_s23 = ssub.s32 %s5531_s18, %s5588_s21  ;;  %p85_p0 = scmp.ne.s32.totalorder %s5527_s17, %s5523_s16 }
   0x8   : > { %p73_p1 = scmp.eq.s32.totalorder %s72_s23, 0  ;;  %p86_p2 = scmp.eq.s32.totalorder %s5584_s19, 1 }
   0x9   : > { %p91_p3 = scmp.ne.s32.totalorder %s5523_s16, %s5519_s15  ;;  %p92_p4 = scmp.eq.s32.totalorder %s4201_s20, 1 }
   0xa   : > { %s5601_s24 = scalar_select %p73_p1, %s5527_s17, %s75_s22  }
   0xb   : > { %p5603_p5 = por %p86_p2, %p85_p0  ;;  %p5607_p6 = por %p92_p4, %p91_p3 }
   0xc   : > { %p4204_p7 = scmp.ge.s32.totalorder %s5531_s18, 1  ;;  %p173_p8 = scmp.lt.s32.totalorder %s5531_s18, 3 }
   0xe   : > { %p174_p9 = pnand %p4204_p7, %p173_p8 }
  0x10   : > { %177 = sbr.rel (%p174_p9) target bundleno = 601 (0x259), region = 28 }
  0x15   : > { %v5334_v0 = vld [vmem:[%s6701_s1 + $0x38] sm:$0xff]   ;;  %p207_p10 = scmp.lt.s32.totalorder %s5584_s19, 1  ;;  %v5335_v1 = vld [vmem:[%s6701_s1 + $0x30] sm:$0xff]   ;;  %v5336_v2 = vld [vmem:[%s6701_s1 + $0x28] sm:$0xff]   ;;  %s6488_s13 = sand.u32 1, %s5523_s16  }
  0x16   : > { %4834 = vmatprep.subr.bf16.mxu0 %v5334_v0  ;;  %5266 = vmatprep.subr.bf16.mxu1 %v5334_v0  ;;  %v5337_v3 = vld [vmem:[%s6701_s1 + $0x20] sm:$0xff]   ;;  %v5338_v18 = vld [vmem:[%s6701_s1 + $0x18] sm:$0xff]   ;;  %v5339_v27 = vld [vmem:[%s6701_s1 + $0x10] sm:$0xff]   ;;  %s4205_s14 = sshll.u32 %s6488_s13, 7  ;;  %s4478_s23 = sshll.u32 %s5584_s19, 11 }
  0x17   : > { %s208_s5 = scalar_select %p207_p10, %s5584_s19, 1  ;;  %4835 = vmatpush3.bf16.msra.mxu0 %v5334_v0  ;;  %5274 = vmatpush3.bf16.msra.mxu1 %v5334_v0  ;;  %v5340_v32 = vld [vmem:[%s6701_s1 + $0x8] sm:$0xff]   ;;  %v5341_v45 = vld [vmem:[%s6701_s1] sm:$0xff]   ;;  %v5344_v48 = vld [vmem:[%s6701_s1 + $0x78] sm:$0xff]  }
  0x18   : > { %4836 = vmatprep.subr.bf16.mxu0 %v5335_v1  ;;  %5267 = vmatprep.subr.bf16.mxu1 %v5335_v1  ;;  %v5345_v55 = vld [vmem:[%s6701_s1 + $0xb8] sm:$0xff]   ;;  %v5346_v60 = vld [vmem:[%s6701_s1 + $0x70] sm:$0xff]   ;;  %s6504_s22 = scalar_lea.vmem [#allocation4], %s4205_s14  ;;  %s6586_s29 = scalar_lea.hbm %s6702_s2, %s4478_s23 }
  0x19   : > { %s5282_s8 = smul.u32 216, %s208_s5  ;;  %v5347_v61 = vld [vmem:[%s6701_s1 + $0xb0] sm:$0xff]   ;;  %s4060_s27 = sshll.u32 %s6504_s22, 4  ;;  %s6588_s27 = int_to_ptr.vmem [resolvable:$true] %s4060_s27 }
  0x1a   : > { %s4039_s30 = scalar_lea.sflag [#allocation5], %s6488_s13  ;;  %s5415_s5 = scalar_lea.vmem %s6588_s27, 2048 }
  0x1b   : > { %s5627_s11 = scalar_lea.vmem %s6700_s0, %s5282_s8  ;;  %4837 = vmatpush3.bf16.msra.mxu0 %v5335_v1  ;;  %5275 = vmatpush3.bf16.msra.mxu1 %v5335_v1  ;;  %p5416_p11 = scmp.ne.s32.totalorder %s6588_s27, %s5415_s5 }
  0x1c   : > { %4838 = vmatprep.subr.bf16.mxu0 %v5336_v2  ;;  %5268 = vmatprep.subr.bf16.mxu1 %v5336_v2  ;;  %v4480_v4 = vld [vmem:[%s5627_s11] sm:$0xff]   ;;  %v5637_v12 = vld [vmem:[%s5627_s11 + $0xc] sm:$0xff]   ;;  %v4595_v19 = vld [vmem:[%s5627_s11 + $0x18] sm:$0xff]   ;;  %s5533_s6 = smov [#allocation4]  }
  0x1d   : > { %v5342_v5 = vld [vmem:[%s5627_s11] sm:$0xff]  ;;  %v4481_v7 = vunpack.c.l.bf16 %v4480_v4  ;;  %v4482_v8 = vunpack.c.h.bf16 %v4480_v4  ;;  %v5640_v13 = vld [vmem:[%s5627_s11 + $0x6c] sm:$0xff]   ;;  %v270_v14 = vunpack.c.l.bf16 %v5637_v12  ;;  %v271_v15 = vunpack.c.h.bf16 %v5637_v12  ;;  %v4599_v20 = vld [vmem:[%s5627_s11 + $0x78] sm:$0xff]   ;;  %p5417_p12 = pnand %p5416_p11, %p5603_p5  ;;  %s5419_s7 = sshll.u32 %s5533_s6, 4  ;;  %s5420_s7 = int_to_ptr.vmem [resolvable:$false] %s5419_s7 }
  0x1e   : > { %v4598_v6 = vld [vmem:[%s5627_s11 + $0x60] sm:$0xff]   ;;  %4850 = vmatprep.mubr.bf16.mxu0 %v5342_v5  ;;  %v294_v16 = vunpack.c.l.bf16 %v5640_v13  ;;  %v295_v17 = vunpack.c.h.bf16 %v5640_v13  ;;  %v4485_v21 = vunpack.c.l.bf16 %v4595_v19  ;;  %v4486_v22 = vunpack.c.h.bf16 %v4595_v19  ;;  %v4596_v33 = vld [vmem:[%s5627_s11 + $0x30] sm:$0xff]   ;;  %v4597_v46 = vld [vmem:[%s5627_s11 + $0x48] sm:$0xff]   ;;  %s5421_s8 = scalar_lea.vmem %s5420_s7, 4096  ;;  %p5422_p0 = scmp.lt.s32.totalorder %s6588_s27, %s5420_s7 }
  0x1f   : > { %v4497_v9 = vunpack.c.l.bf16 %v4598_v6  ;;  %v4498_v10 = vunpack.c.h.bf16 %v4598_v6  ;;  %v5343_v11 = vld [vmem:[%s5627_s11 + $0x60] sm:$0xff]  ;;  %4839 = vmatpush3.bf16.msra.mxu0 %v5336_v2  ;;  %5276 = vmatpush3.bf16.msra.mxu1 %v5336_v2  ;;  %321 = vst [vmem:[#allocation2] sm:$0xff] %v4481_v7  ;;  %322 = vst [vmem:[#allocation2 + $0x8] sm:$0xff] %v4482_v8  ;;  %v4501_v23 = vunpack.c.l.bf16 %v4599_v20  ;;  %v4502_v24 = vunpack.c.h.bf16 %v4599_v20  ;;  %v4600_v34 = vld [vmem:[%s5627_s11 + $0x90] sm:$0xff]   ;;  %p5418_p13 = pneg %p5417_p12  ;;  %p5423_p1 = scmp.lt.s32.totalorder %s5421_s8, %s5415_s5 }
  0x20   : > { %4840 = vmatprep.subr.bf16.mxu0 %v5337_v3  ;;  %5269 = vmatprep.subr.bf16.mxu1 %v5337_v3  ;;  %324 = vst [vmem:[#allocation2 + $0x18] sm:$0xff] %v270_v14  ;;  %325 = vst [vmem:[#allocation2 + $0x20] sm:$0xff] %v271_v15  ;;  %v5652_v25 = vld [vmem:[%s5627_s11 + $0x24] sm:$0xff]   ;;  %v4489_v35 = vunpack.c.l.bf16 %v4596_v33  ;;  %v4490_v36 = vunpack.c.h.bf16 %v4596_v33  ;;  %v4505_v37 = vunpack.c.l.bf16 %v4600_v34  ;;  %v4506_v38 = vunpack.c.h.bf16 %v4600_v34  ;;  %v5670_v39 = vld [vmem:[%s5627_s11 + $0x3c] sm:$0xff]  }
  0x21   : > { %345 = vst [vmem:[#allocation2 + $0xc0] sm:$0xff] %v4497_v9  ;;  %346 = vst [vmem:[#allocation2 + $0xc8] sm:$0xff] %v4498_v10  ;;  %4866 = vmatprep.mubr.bf16.mxu1 %v5343_v11  ;;  %v5655_v26 = vld [vmem:[%s5627_s11 + $0x84] sm:$0xff]   ;;  %v276_v28 = vunpack.c.l.bf16 %v5652_v25  ;;  %v277_v29 = vunpack.c.h.bf16 %v5652_v25  ;;  %v5673_v40 = vld [vmem:[%s5627_s11 + $0x9c] sm:$0xff]   ;;  %v282_v41 = vunpack.c.l.bf16 %v5670_v39  ;;  %v283_v42 = vunpack.c.h.bf16 %v5670_v39  ;;  %p5424_p2 = por %p5423_p1, %p5422_p0 }
  0x22   : > { %348 = vst [vmem:[#allocation2 + $0xd8] sm:$0xff] %v294_v16  ;;  %349 = vst [vmem:[#allocation2 + $0xe0] sm:$0xff] %v295_v17  ;;  %v300_v30 = vunpack.c.l.bf16 %v5655_v26  ;;  %v301_v31 = vunpack.c.h.bf16 %v5655_v26  ;;  %v306_v43 = vunpack.c.l.bf16 %v5673_v40  ;;  %v307_v44 = vunpack.c.h.bf16 %v5673_v40  ;;  %v4601_v47 = vld [vmem:[%s5627_s11 + $0xa8] sm:$0xff]   ;;  %v5688_v53 = vld [vmem:[%s5627_s11 + $0x54] sm:$0xff]  }
  0x23   : > { %4841 = vmatpush3.bf16.msra.mxu0 %v5337_v3  ;;  %5277 = vmatpush3.bf16.msra.mxu1 %v5337_v3  ;;  %327 = vst [vmem:[#allocation2 + $0x30] sm:$0xff] %v4485_v21  ;;  %328 = vst [vmem:[#allocation2 + $0x38] sm:$0xff] %v4486_v22  ;;  %v4493_v49 = vunpack.c.l.bf16 %v4597_v46  ;;  %v4494_v50 = vunpack.c.h.bf16 %v4597_v46  ;;  %v4509_v51 = vunpack.c.l.bf16 %v4601_v47  ;;  %v4510_v52 = vunpack.c.h.bf16 %v4601_v47  ;;  %v5691_v54 = vld [vmem:[%s5627_s11 + $0xb4] sm:$0xff]   ;;  %v215_v62 = vld [vmem:[%s5627_s11 + $0x8] sm:$0x1]  ;;  %p5425_p3 = pnand %p5424_p2, %p5418_p13 }
  0x24   : > { %4842 = vmatprep.subr.bf16.mxu0 %v5338_v18  ;;  %5270 = vmatprep.subr.bf16.mxu1 %v5338_v18  ;;  %351 = vst [vmem:[#allocation2 + $0xf0] sm:$0xff] %v4501_v23  ;;  %352 = vst [vmem:[#allocation2 + $0xf8] sm:$0xff] %v4502_v24  ;;  %v288_v56 = vunpack.c.l.bf16 %v5688_v53  ;;  %v289_v57 = vunpack.c.h.bf16 %v5688_v53  ;;  %v312_v58 = vunpack.c.l.bf16 %v5691_v54  ;;  %v313_v59 = vunpack.c.h.bf16 %v5691_v54  ;;  %v5708_v63 = vld [vmem:[%s5627_s11 + $0x18] sm:$0xff]  ;;  %v218_v2 = vld [vmem:[%s5627_s11 + $0x14] sm:$0x1] }
  0x25   : > { %330 = vst [vmem:[#allocation2 + $0x48] sm:$0xff] %v276_v28  ;;  %331 = vst [vmem:[#allocation2 + $0x50] sm:$0xff] %v277_v29  ;;  %v5349_v0 = vld [vmem:[%s5627_s11 + $0x78] sm:$0xff]  ;;  %v269_v1 = vunpack.c.l.bf16 %v215_v62  ;;  %v272_v3 = vunpack.c.l.bf16 %v218_v2  ;;  %v5350_v4 = vld [vmem:[%s6701_s1 + $0x68] sm:$0xff]  }
  0x26   : > { %354 = vst [vmem:[#allocation2 + $0x108] sm:$0xff] %v300_v30  ;;  %355 = vst [vmem:[#allocation2 + $0x110] sm:$0xff] %v301_v31  ;;  %v5351_v5 = vld [vmem:[%s6701_s1 + $0xa8] sm:$0xff]   ;;  %v221_v6 = vld [vmem:[%s5627_s11 + $0x20] sm:$0x1] }
  0x27   : > { %4843 = vmatpush3.bf16.msra.mxu0 %v5338_v18  ;;  %5278 = vmatpush3.bf16.msra.mxu1 %v5338_v18  ;;  %333 = vst [vmem:[#allocation2 + $0x60] sm:$0xff] %v4489_v35  ;;  %334 = vst [vmem:[#allocation2 + $0x68] sm:$0xff] %v4490_v36  ;;  %v275_v7 = vunpack.c.l.bf16 %v221_v6  ;;  %v224_v8 = vld [vmem:[%s5627_s11 + $0x2c] sm:$0x1]  ;;  %v5352_v10 = vld [vmem:[%s6701_s1 + $0x60] sm:$0xff]  }
  0x28   : > { %4844 = vmatprep.subr.bf16.mxu0 %v5339_v27  ;;  %5271 = vmatprep.subr.bf16.mxu1 %v5339_v27  ;;  %357 = vst [vmem:[#allocation2 + $0x120] sm:$0xff] %v4505_v37  ;;  %358 = vst [vmem:[#allocation2 + $0x128] sm:$0xff] %v4506_v38  ;;  %v278_v9 = vunpack.c.l.bf16 %v224_v8  ;;  %v5353_v11 = vld [vmem:[%s6701_s1 + $0xa0] sm:$0xff]   ;;  %v5731_v14 = vld [vmem:[%s5627_s11 + $0x30] sm:$0xff] }
  0x29   : > { %336 = vst [vmem:[#allocation2 + $0x78] sm:$0xff] %v282_v41  ;;  %337 = vst [vmem:[#allocation2 + $0x80] sm:$0xff] %v283_v42  ;;  %v5734_v15 = vld [vmem:[%s5627_s11 + $0x90] sm:$0xff]  ;;  %v230_v17 = vld [vmem:[%s5627_s11 + $0x44] sm:$0x1] }
  0x2a   : > { %360 = vst [vmem:[#allocation2 + $0x138] sm:$0xff] %v306_v43  ;;  %361 = vst [vmem:[#allocation2 + $0x140] sm:$0xff] %v307_v44  ;;  %v284_v18 = vunpack.c.l.bf16 %v230_v17  ;;  %v5356_v19 = vld [vmem:[%s6701_s1 + $0x58] sm:$0xff]   ;;  %v233_v21 = vld [vmem:[%s5627_s11 + $0x50] sm:$0x1] }
  0x2b   : > { %4845 = vmatpush3.bf16.msra.mxu0 %v5339_v27  ;;  %5279 = vmatpush3.bf16.msra.mxu1 %v5339_v27  ;;  %339 = vst [vmem:[#allocation2 + $0x90] sm:$0xff] %v4493_v49  ;;  %340 = vst [vmem:[#allocation2 + $0x98] sm:$0xff] %v4494_v50  ;;  %v5357_v20 = vld [vmem:[%s6701_s1 + $0x98] sm:$0xff]   ;;  %v287_v22 = vunpack.c.l.bf16 %v233_v21  ;;  %v5358_v23 = vld [vmem:[%s6701_s1 + $0x50] sm:$0xff]  }
  0x2c   : > { %4846 = vmatprep.subr.bf16.mxu0 %v5340_v32  ;;  %5272 = vmatprep.subr.bf16.mxu1 %v5340_v32  ;;  %363 = vst [vmem:[#allocation2 + $0x150] sm:$0xff] %v4509_v51  ;;  %364 = vst [vmem:[#allocation2 + $0x158] sm:$0xff] %v4510_v52  ;;  %v236_v24 = vld [vmem:[%s5627_s11 + $0x5c] sm:$0x1]  ;;  %v5756_v27 = vld [vmem:[%s5627_s11 + $0x48] sm:$0xff] }
  0x2d   : > { %342 = vst [vmem:[#allocation2 + $0xa8] sm:$0xff] %v288_v56  ;;  %343 = vst [vmem:[#allocation2 + $0xb0] sm:$0xff] %v289_v57  ;;  %v290_v28 = vunpack.c.l.bf16 %v236_v24  ;;  %v5759_v29 = vld [vmem:[%s5627_s11 + $0xa8] sm:$0xff]  ;;  %v242_v37 = vld [vmem:[%s5627_s11 + $0x74] sm:$0x1] }
  0x2e   : > { %366 = vst [vmem:[#allocation2 + $0x168] sm:$0xff] %v312_v58  ;;  %367 = vst [vmem:[#allocation2 + $0x170] sm:$0xff] %v313_v59  ;;  %v5362_v30 = vld [vmem:[%s6701_s1 + $0x48] sm:$0xff]   ;;  %v296_v41 = vunpack.c.l.bf16 %v242_v37  ;;  %v5364_v42 = vld [vmem:[%s6701_s1 + $0x40] sm:$0xff]  }
  0x2f   : > { %4847 = vmatpush3.bf16.msra.mxu0 %v5340_v32  ;;  %5280 = vmatpush3.bf16.msra.mxu1 %v5340_v32  ;;  %323 = vst [vmem:[#allocation2 + $0x10] sm:$0x3] %v269_v1  ;;  %326 = vst [vmem:[#allocation2 + $0x28] sm:$0x3] %v272_v3  ;;  %v5363_v31 = vld [vmem:[%s6701_s1 + $0x88] sm:$0xff]   ;;  %v5365_v43 = vld [vmem:[%s6701_s1 + $0x80] sm:$0xff]  }
  0x30   : > { %4848 = vmatprep.subr.bf16.mxu0 %v5341_v45  ;;  %5273 = vmatprep.subr.bf16.mxu1 %v5341_v45  ;;  %329 = vst [vmem:[#allocation2 + $0x40] sm:$0x3] %v275_v7  ;;  %332 = vst [vmem:[#allocation2 + $0x58] sm:$0x3] %v278_v9  ;;  %v776_v32 = vld [vmem:[#allocation2 + $0x1] sm:$0xff]  ;;  %v778_v47 = vld [vmem:[#allocation2 + $0x19] sm:$0xff] }
  0x31   : > { %338 = vst [vmem:[#allocation2 + $0x88] sm:$0x3] %v284_v18  ;;  %341 = vst [vmem:[#allocation2 + $0xa0] sm:$0x3] %v287_v22  ;;  %v239_v33 = vld [vmem:[%s5627_s11 + $0x68] sm:$0x1] }
  0x32   : > { %344 = vst [vmem:[#allocation2 + $0xb8] sm:$0x3] %v290_v28  ;;  %v1146_v35 = vld [vmem:[#allocation2 + $0x2] sm:$0xff]  ;;  %v293_v36 = vunpack.c.l.bf16 %v239_v33  ;;  %350 = vst [vmem:[#allocation2 + $0xe8] sm:$0x3] %v296_v41  ;;  %v5366_v51 = vld [vmem:[%s6701_s1 + $0xf8] sm:$0xff]  }
  0x33   : > { %4849 = vmatpush3.bf16.msra.mxu0 %v5341_v45  ;;  %5281 = vmatpush3.bf16.msra.mxu1 %v5341_v45  ;;  %v245_v44 = vld [vmem:[%s5627_s11 + $0x80] sm:$0x1]  ;;  %v5367_v52 = vld [vmem:[%s6701_s1 + $0x138] sm:$0xff]   ;;  %v254_v3 = vld [vmem:[%s5627_s11 + $0xa4] sm:$0x1] }
  0x34   : > { %4882 = vmatprep.subr.bf16.mxu1 %v5344_v48  ;;  %4930 = vmatprep.subr.bf16.mxu0 %v5345_v55  ;;  %347 = vst [vmem:[#allocation2 + $0xd0] sm:$0x3] %v293_v36  ;;  %v299_v49 = vunpack.c.l.bf16 %v245_v44  ;;  %v780_v57 = vld [vmem:[#allocation2 + $0x31] sm:$0xff]  ;;  %v308_v7 = vunpack.c.l.bf16 %v254_v3  ;;  %v782_v8 = vld [vmem:[#allocation2 + $0x49] sm:$0xff]  ;;  %v260_v24 = vld [vmem:[%s5627_s11 + $0xbc] sm:$0x1] }
  0x35   : > { %v1150_v59 = vld [vmem:[#allocation2 + $0x32] sm:$0xff]  ;;  %v1152_v9 = vld [vmem:[#allocation2 + $0x4a] sm:$0xff]  ;;  %v5372_v33 = vld [vmem:[%s6701_s1 + $0xe0] sm:$0xff]  }
  0x36   : > { %4851 = vmatmul.mubr.bf16.vlgmr.msra.gmra.mxu0 %v5637_v12  ;;  %4867 = vmatmul.mubr.bf16.vlgmr.msra.gmra.mxu1 %v5640_v13  ;;  %v227_v13 = vld [vmem:[%s5627_s11 + $0x38] sm:$0x1]  ;;  %v777_v34 = vld [vmem:[#allocation2 + $0x9] sm:$0xff]  ;;  %v779_v50 = vld [vmem:[#allocation2 + $0x21] sm:$0xff]  ;;  %353 = vst [vmem:[#allocation2 + $0x100] sm:$0x3] %v299_v49 }
  0x37   : > { %4883 = vmatpush3.bf16.msra.mxu1 %v5344_v48  ;;  %4931 = vmatpush3.bf16.msra.mxu0 %v5345_v55  ;;  %v281_v16 = vunpack.c.l.bf16 %v227_v13  ;;  %v1147_v38 = vld [vmem:[#allocation2 + $0xa] sm:$0xff]  ;;  %v808_v45 = vpack.c.bf16 %v777_v34, %v776_v32  ;;  %v1148_v48 = vld [vmem:[#allocation2 + $0x1a] sm:$0xff]  ;;  %v1149_v56 = vld [vmem:[#allocation2 + $0x22] sm:$0xff]  ;;  %362 = vst [vmem:[#allocation2 + $0x148] sm:$0x3] %v308_v7 }
  0x38   : > { %4884 = vmatprep.subr.bf16.mxu1 %v5346_v60  ;;  %4932 = vmatprep.subr.bf16.mxu0 %v5347_v61  ;;  %v1178_v46 = vpack.c.bf16 %v1147_v38, %v1146_v35  ;;  %v248_v55 = vld [vmem:[%s5627_s11 + $0x8c] sm:$0x1]  ;;  %v251_v62 = vld [vmem:[%s5627_s11 + $0x98] sm:$0x1]  ;;  %v5792_v1 = vpack.c.bf16 %v1149_v56, %v1148_v48  ;;  %v5368_v6 = vld [vmem:[%s6701_s1 + $0xf0] sm:$0xff]  }
  0x39   : > { %4854 = vmatprep.mubr.bf16.mxu0 %v5708_v63  ;;  %4870 = vmatprep.mubr.bf16.mxu1 %v5349_v0  ;;  %335 = vst [vmem:[#allocation2 + $0x70] sm:$0x3] %v281_v16  ;;  %v302_v58 = vunpack.c.l.bf16 %v248_v55  ;;  %v5790_v0 = vpack.c.bf16 %v779_v50, %v778_v47  ;;  %v305_v2 = vunpack.c.l.bf16 %v251_v62  ;;  %v1154_v13 = vld [vmem:[#allocation2 + $0x62] sm:$0xff]  ;;  %v783_v17 = vld [vmem:[#allocation2 + $0x51] sm:$0xff]  ;;  %v786_v34 = vld [vmem:[#allocation2 + $0x79] sm:$0xff] }
  0x3a   : > { %v5370_v16 = vld [vmem:[%s6701_s1 + $0xe8] sm:$0xff]   ;;  %v1153_v18 = vld [vmem:[#allocation2 + $0x52] sm:$0xff]  ;;  %v1156_v36 = vld [vmem:[#allocation2 + $0x7a] sm:$0xff] }
  0x3b   : > { %4885 = vmatpush3.bf16.msra.mxu1 %v5346_v60  ;;  %4933 = vmatpush3.bf16.msra.mxu0 %v5347_v61  ;;  %v781_v60 = vld [vmem:[#allocation2 + $0x39] sm:$0xff]  ;;  %356 = vst [vmem:[#allocation2 + $0x118] sm:$0x3] %v302_v58  ;;  %359 = vst [vmem:[#allocation2 + $0x130] sm:$0x3] %v305_v2  ;;  %v5371_v22 = vld [vmem:[%s6701_s1 + $0x128] sm:$0xff]   ;;  %v5819_v28 = vpack.c.bf16 %v1153_v18, %v1152_v9 }
  0x3c   : > { %4886 = vmatprep.subr.bf16.mxu1 %v5350_v4  ;;  %4934 = vmatprep.subr.bf16.mxu0 %v5351_v5  ;;  %v1151_v61 = vld [vmem:[#allocation2 + $0x3a] sm:$0xff]  ;;  %v1157_v38 = vld [vmem:[#allocation2 + $0x82] sm:$0xff]  ;;  %v788_v41 = vld [vmem:[#allocation2 + $0x91] sm:$0xff] }
  0x3d   : > { %v787_v35 = vld [vmem:[#allocation2 + $0x81] sm:$0xff]  ;;  %v5843_v48 = vpack.c.bf16 %v1157_v38, %v1156_v36  ;;  %v1160_v55 = vld [vmem:[#allocation2 + $0xaa] sm:$0xff] }
  0x3e   : > { %4855 = vmatmul.mubr.bf16.gmra.mxu0 %v5652_v25  ;;  %4871 = vmatmul.mubr.bf16.gmra.mxu1 %v5655_v26  ;;  %v5359_v26 = vld [vmem:[%s6701_s1 + $0x90] sm:$0xff]   ;;  %v5373_v37 = vld [vmem:[%s6701_s1 + $0x120] sm:$0xff]   ;;  %v5841_v47 = vpack.c.bf16 %v787_v35, %v786_v34  ;;  %v5378_v2 = vld [vmem:[%s6701_s1 + $0xc8] sm:$0xff]  }
  0x3f   : > { %4887 = vmatpush3.bf16.msra.mxu1 %v5350_v4  ;;  %4935 = vmatpush3.bf16.msra.mxu0 %v5351_v5  ;;  %v5795_v4 = vpack.c.bf16 %v781_v60, %v780_v57  ;;  %v5797_v5 = vpack.c.bf16 %v1151_v61, %v1150_v59  ;;  %v1159_v44 = vld [vmem:[#allocation2 + $0x9a] sm:$0xff]  ;;  %v5377_v56 = vld [vmem:[%s6701_s1 + $0x110] sm:$0xff]   ;;  %v1162_v58 = vld [vmem:[#allocation2 + $0xc2] sm:$0xff] }
  0x40   : > { %4888 = vmatprep.subr.bf16.mxu1 %v5352_v10  ;;  %4936 = vmatprep.subr.bf16.mxu0 %v5353_v11  ;;  %v1155_v21 = vld [vmem:[#allocation2 + $0x6a] sm:$0xff]  ;;  %v792_v57 = vld [vmem:[#allocation2 + $0xc1] sm:$0xff]  ;;  %v1161_v60 = vld [vmem:[#allocation2 + $0xb2] sm:$0xff] }
  0x41   : > { %4858 = vmatprep.mubr.bf16.mxu0 %v5731_v14  ;;  %4874 = vmatprep.mubr.bf16.mxu1 %v5734_v15  ;;  %v5823_v32 = vpack.c.bf16 %v1155_v21, %v1154_v13  ;;  %v791_v59 = vld [vmem:[#allocation2 + $0xb1] sm:$0xff]  ;;  %v793_v61 = vld [vmem:[#allocation2 + $0xc9] sm:$0xff]  ;;  %v5867_v7 = vpack.c.bf16 %v1161_v60, %v1160_v55  ;;  %v795_v13 = vld [vmem:[#allocation2 + $0xe1] sm:$0xff] }
  0x42   : > { %v1163_v62 = vld [vmem:[#allocation2 + $0xca] sm:$0xff]  ;;  %v5381_v18 = vld [vmem:[%s6701_s1 + $0x100] sm:$0xff]   ;;  %v1166_v21 = vld [vmem:[#allocation2 + $0xf2] sm:$0xff] }
  0x43   : > { %4889 = vmatpush3.bf16.msra.mxu1 %v5352_v10  ;;  %4937 = vmatpush3.bf16.msra.mxu0 %v5353_v11  ;;  %v5369_v10 = vld [vmem:[%s6701_s1 + $0x130] sm:$0xff]   ;;  %v784_v11 = vld [vmem:[#allocation2 + $0x61] sm:$0xff]  ;;  %v5871_v9 = vpack.c.bf16 %v1163_v62, %v1162_v58  ;;  %v5893_v35 = vld [vmem:[%s6701_s1 + $0x1b8] sm:$0xff]  }
  0x44   : > { %4890 = vmatprep.subr.bf16.mxu1 %v5356_v19  ;;  %4938 = vmatprep.subr.bf16.mxu0 %v5357_v20  ;;  %v5379_v3 = vld [vmem:[%s6701_s1 + $0x108] sm:$0xff]  }
  0x45   : > { %v263_v34 = vld [vmem:[%s5627_s11 + $0xc8] sm:$0x1]  ;;  %v801_v55 = vld [vmem:[#allocation2 + $0x129] sm:$0xff] }
  0x46   : > { %4859 = vmatmul.mubr.bf16.gmra.mxu0 %v5670_v39  ;;  %4875 = vmatmul.mubr.bf16.gmra.mxu1 %v5673_v40  ;;  %v317_v36 = vunpack.c.l.bf16 %v263_v34  ;;  %v803_v62 = vld [vmem:[#allocation2 + $0x141] sm:$0xff] }
  0x47   : > { %4891 = vmatpush3.bf16.msra.mxu1 %v5356_v19  ;;  %4939 = vmatpush3.bf16.msra.mxu0 %v5357_v20  ;;  %v257_v19 = vld [vmem:[%s5627_s11 + $0xb0] sm:$0x1] }
  0x48   : > { %4892 = vmatprep.subr.bf16.mxu1 %v5358_v23  ;;  %4940 = vmatprep.subr.bf16.mxu0 %v5359_v26  ;;  %v785_v20 = vld [vmem:[#allocation2 + $0x69] sm:$0xff]  ;;  %371 = vst [vmem:[#allocation2 + $0x190] sm:$0x3] %v317_v36 }
  0x49   : > { %4862 = vmatprep.mubr.bf16.mxu0 %v5756_v27  ;;  %4878 = vmatprep.mubr.bf16.mxu1 %v5759_v29 }
  0x4b   : > { %4893 = vmatpush3.bf16.msra.mxu1 %v5358_v23  ;;  %4941 = vmatpush3.bf16.msra.mxu0 %v5359_v26  ;;  %v311_v23 = vunpack.c.l.bf16 %v257_v19  ;;  %v5817_v26 = vpack.c.bf16 %v783_v17, %v782_v8  ;;  %v5869_v8 = vpack.c.bf16 %v793_v61, %v792_v57  ;;  %v1165_v17 = vld [vmem:[#allocation2 + $0xe2] sm:$0xff]  ;;  %v796_v19 = vld [vmem:[#allocation2 + $0xf1] sm:$0xff]  ;;  %v802_v61 = vld [vmem:[#allocation2 + $0x139] sm:$0xff] }
  0x4c   : > { %4894 = vmatprep.subr.bf16.mxu1 %v5362_v30  ;;  %4942 = vmatprep.subr.bf16.mxu0 %v5363_v31 }
  0x4d   : > { %365 = vst [vmem:[#allocation2 + $0x160] sm:$0x3] %v311_v23  ;;  %v5886_v23 = vld [vmem:[%s6701_s1 + $0x178] sm:$0xff]  }
  0x4e   : > { %4863 = vmatmul.mubr.bf16.gmra.mxu0 %v5688_v53  ;;  %4879 = vmatmul.mubr.bf16.gmra.mxu1 %v5691_v54 }
  0x4f   : > { %4895 = vmatpush3.bf16.msra.mxu1 %v5362_v30  ;;  %4943 = vmatpush3.bf16.msra.mxu0 %v5363_v31  ;;  %v314_v30 = vunpack.c.l.bf16 %v260_v24  ;;  %v5821_v31 = vpack.c.bf16 %v785_v20, %v784_v11  ;;  %v794_v11 = vld [vmem:[#allocation2 + $0xd9] sm:$0xff] }
  0x50   : > { %4896 = vmatprep.subr.bf16.mxu1 %v5364_v42  ;;  %4944 = vmatprep.subr.bf16.mxu0 %v5365_v43  ;;  %v797_v20 = vld [vmem:[#allocation2 + $0xf9] sm:$0xff] }
  0x51   : > { %4898 = vmatprep.mubr.bf16.mxu1 %v808_v45  ;;  %4946 = vmatprep.mubr.bf16.mxu0 %v1178_v46  ;;  %368 = vst [vmem:[#allocation2 + $0x178] sm:$0x3] %v314_v30  ;;  %v5374_v45 = vld [vmem:[%s6701_s1 + $0xd8] sm:$0xff]   ;;  %v4602_v24 = vld [vmem:[%s5627_s11 + $0xc0] sm:$0xff]  }
  0x52   : > { %v5375_v46 = vld [vmem:[%s6701_s1 + $0x118] sm:$0xff]   ;;  %v4513_v30 = vunpack.c.l.bf16 %v4602_v24 }
  0x53   : > { %4897 = vmatpush3.bf16.msra.mxu1 %v5364_v42  ;;  %4945 = vmatpush3.bf16.msra.mxu0 %v5365_v43  ;;  %v1158_v42 = vld [vmem:[#allocation2 + $0x92] sm:$0xff] }
  0x54   : > { %4978 = vmatprep.subr.bf16.mxu1 %v5366_v51  ;;  %5026 = vmatprep.subr.bf16.mxu0 %v5367_v52  ;;  %v789_v43 = vld [vmem:[#allocation2 + $0x99] sm:$0xff]  ;;  %v5847_v50 = vpack.c.bf16 %v1159_v44, %v1158_v42  ;;  %369 = vst [vmem:[#allocation2 + $0x180] sm:$0xff] %v4513_v30  ;;  %v1168_v44 = vld [vmem:[#allocation2 + $0x10a] sm:$0xff] }
  0x55   : > { %v5845_v49 = vpack.c.bf16 %v789_v43, %v788_v41  ;;  %v5899_v41 = vpack.c.bf16 %v797_v20, %v796_v19  ;;  %v798_v43 = vld [vmem:[#allocation2 + $0x109] sm:$0xff] }
  0x56   : > { %4899 = vmatmul.mubr.bf16.vlgmr.msra.gmra.mxu1 %v5790_v0  ;;  %4947 = vmatmul.mubr.bf16.vlgmr.msra.gmra.mxu0 %v5792_v1 }
  0x57   : > { %4979 = vmatpush3.bf16.msra.mxu1 %v5366_v51  ;;  %5027 = vmatpush3.bf16.msra.mxu0 %v5367_v52  ;;  %v5376_v51 = vld [vmem:[%s6701_s1 + $0xd0] sm:$0xff]  }
  0x58   : > { %4902 = vmatprep.mubr.bf16.mxu1 %v5795_v4  ;;  %4950 = vmatprep.mubr.bf16.mxu0 %v5797_v5  ;;  %v790_v52 = vld [vmem:[#allocation2 + $0xa9] sm:$0xff]  ;;  %v1177_v30 = vld [vmem:[#allocation2 + $0x172] sm:$0xff] }
  0x59   : > { %4980 = vmatprep.subr.bf16.mxu1 %v5368_v6  ;;  %5028 = vmatprep.subr.bf16.mxu0 %v5369_v10 }
  0x5b   : > { %4981 = vmatpush3.bf16.msra.mxu1 %v5368_v6  ;;  %5029 = vmatpush3.bf16.msra.mxu0 %v5369_v10  ;;  %v5865_v6 = vpack.c.bf16 %v791_v59, %v790_v52  ;;  %v5380_v10 = vld [vmem:[%s6701_s1 + $0xc0] sm:$0xff]  }
  0x5c   : > { %4982 = vmatprep.subr.bf16.mxu1 %v5370_v16  ;;  %5030 = vmatprep.subr.bf16.mxu0 %v5371_v22  ;;  %v1170_v52 = vld [vmem:[#allocation2 + $0x122] sm:$0xff] }
  0x5e   : > { %4903 = vmatmul.mubr.bf16.gmra.mxu1 %v5817_v26  ;;  %4951 = vmatmul.mubr.bf16.gmra.mxu0 %v5819_v28 }
  0x5f   : > { %4906 = vmatprep.mubr.bf16.mxu1 %v5821_v31  ;;  %4954 = vmatprep.mubr.bf16.mxu0 %v5823_v32 }
  0x60   : > { %4983 = vmatpush3.bf16.msra.mxu1 %v5370_v16  ;;  %5031 = vmatpush3.bf16.msra.mxu0 %v5371_v22  ;;  %v1164_v16 = vld [vmem:[#allocation2 + $0xda] sm:$0xff] }
  0x61   : > { %4984 = vmatprep.subr.bf16.mxu1 %v5372_v33  ;;  %5032 = vmatprep.subr.bf16.mxu0 %v5373_v37  ;;  %v1167_v22 = vld [vmem:[#allocation2 + $0xfa] sm:$0xff]  ;;  %v5897_v38 = vpack.c.bf16 %v1165_v17, %v1164_v16  ;;  %v5921_v17 = vpack.c.bf16 %v803_v62, %v802_v61  ;;  %v1537_v61 = vld [vmem:[#allocation2 + $0x108] sm:$0xff]  ;;  %v1538_v62 = vld [vmem:[#allocation2 + $0x110] sm:$0xff] }
  0x62   : > { %v5901_v42 = vpack.c.bf16 %v1167_v22, %v1166_v21  ;;  %v1175_v16 = vld [vmem:[#allocation2 + $0x15a] sm:$0xff]  ;;  %v806_v21 = vld [vmem:[#allocation2 + $0x169] sm:$0xff]  ;;  %v807_v22 = vld [vmem:[#allocation2 + $0x171] sm:$0xff] }
  0x63   : > { %v5936_v34 = vpack.c.bf16 %v807_v22, %v806_v21 }
  0x64   : > { %4985 = vmatpush3.bf16.msra.mxu1 %v5372_v33  ;;  %5033 = vmatpush3.bf16.msra.mxu0 %v5373_v37  ;;  %v4514_v33 = vunpack.c.h.bf16 %v4602_v24  ;;  %v5895_v37 = vpack.c.bf16 %v795_v13, %v794_v11  ;;  %v1174_v11 = vld [vmem:[#allocation2 + $0x152] sm:$0xff]  ;;  %v1176_v24 = vld [vmem:[#allocation2 + $0x16a] sm:$0xff] }
  0x65   : > { %4986 = vmatprep.subr.bf16.mxu1 %v5374_v45  ;;  %5034 = vmatprep.subr.bf16.mxu0 %v5375_v46  ;;  %v805_v13 = vld [vmem:[#allocation2 + $0x159] sm:$0xff]  ;;  %v5927_v20 = vpack.c.bf16 %v1175_v16, %v1174_v11  ;;  %v5938_v36 = vpack.c.bf16 %v1177_v30, %v1176_v24  ;;  %v5401_v24 = vld [vmem:[%s6701_s1 + $0x1f0] sm:$0xff]  }
  0x66   : > { %4907 = vmatmul.mubr.bf16.gmra.mxu1 %v5841_v47  ;;  %4955 = vmatmul.mubr.bf16.gmra.mxu0 %v5843_v48  ;;  %370 = vst [vmem:[#allocation2 + $0x188] sm:$0xff] %v4514_v33  ;;  %v5934_v33 = vld [vmem:[%s5627_s11 + $0xcc] sm:$0xff]  }
  0x67   : > { %4910 = vmatprep.mubr.bf16.mxu1 %v5845_v49  ;;  %4958 = vmatprep.mubr.bf16.mxu0 %v5847_v50  ;;  %v5402_v30 = vld [vmem:[%s6701_s1 + $0x230] sm:$0xff]  }
  0x68   : > { %4987 = vmatpush3.bf16.msra.mxu1 %v5374_v45  ;;  %5035 = vmatpush3.bf16.msra.mxu0 %v5375_v46  ;;  %v799_v45 = vld [vmem:[#allocation2 + $0x111] sm:$0xff] }
  0x69   : > { %4988 = vmatprep.subr.bf16.mxu1 %v5376_v51  ;;  %5036 = vmatprep.subr.bf16.mxu0 %v5377_v56  ;;  %v1169_v46 = vld [vmem:[#allocation2 + $0x112] sm:$0xff]  ;;  %v5909_v57 = vpack.c.bf16 %v799_v45, %v798_v43  ;;  %v318_v43 = vunpack.c.l.bf16 %v5934_v33 }
  0x6a   : > { %v5911_v58 = vpack.c.bf16 %v1169_v46, %v1168_v44  ;;  %v319_v44 = vunpack.c.h.bf16 %v5934_v33  ;;  %v5384_v45 = vld [vmem:[%s6701_s1 + $0x170] sm:$0xff]  }
  0x6b   : > { %372 = vst [vmem:[#allocation2 + $0x198] sm:$0xff] %v318_v43  ;;  %v5385_v46 = vld [vmem:[%s6701_s1 + $0x1b0] sm:$0xff]  }
  0x6c   : > { %4989 = vmatpush3.bf16.msra.mxu1 %v5376_v51  ;;  %5037 = vmatpush3.bf16.msra.mxu0 %v5377_v56  ;;  %v800_v51 = vld [vmem:[#allocation2 + $0x121] sm:$0xff]  ;;  %v1171_v56 = vld [vmem:[#allocation2 + $0x12a] sm:$0xff]  ;;  %373 = vst [vmem:[#allocation2 + $0x1a0] sm:$0xff] %v319_v44  ;;  %v2637_v44 = vld [vmem:[#allocation2 + $0x98] sm:$0xff] }
  0x6d   : > { %4990 = vmatprep.subr.bf16.mxu1 %v5378_v2  ;;  %5038 = vmatprep.subr.bf16.mxu0 %v5379_v3  ;;  %v5913_v59 = vpack.c.bf16 %v801_v55, %v800_v51  ;;  %v5915_v60 = vpack.c.bf16 %v1171_v56, %v1170_v52  ;;  %v5394_v51 = vld [vmem:[%s6701_s1 + $0x148] sm:$0xff]   ;;  %v5398_v52 = vld [vmem:[%s6701_s1 + $0x180] sm:$0xff]   ;;  %v1535_v55 = vld [vmem:[#allocation2 + $0xf0] sm:$0xff] }
  0x6e   : > { %4911 = vmatmul.mubr.bf16.gmra.mxu1 %v5865_v6  ;;  %4959 = vmatmul.mubr.bf16.gmra.mxu0 %v5867_v7  ;;  %v1536_v56 = vld [vmem:[#allocation2 + $0xf8] sm:$0xff]  ;;  %v2636_v43 = vld [vmem:[#allocation2 + $0x90] sm:$0xff] }
  0x6f   : > { %4914 = vmatprep.mubr.bf16.mxu1 %v5869_v8  ;;  %4962 = vmatprep.mubr.bf16.mxu0 %v5871_v9 }
  0x70   : > { %4991 = vmatpush3.bf16.msra.mxu1 %v5378_v2  ;;  %5039 = vmatpush3.bf16.msra.mxu0 %v5379_v3  ;;  %v1172_v2 = vld [vmem:[#allocation2 + $0x13a] sm:$0xff]  ;;  %v1173_v3 = vld [vmem:[#allocation2 + $0x142] sm:$0xff] }
  0x71   : > { %4992 = vmatprep.subr.bf16.mxu1 %v5380_v10  ;;  %5040 = vmatprep.subr.bf16.mxu0 %v5381_v18 }
  0x74   : > { %4993 = vmatpush3.bf16.msra.mxu1 %v5380_v10  ;;  %5041 = vmatpush3.bf16.msra.mxu0 %v5381_v18  ;;  %v804_v10 = vld [vmem:[#allocation2 + $0x151] sm:$0xff]  ;;  %v5923_v18 = vpack.c.bf16 %v1173_v3, %v1172_v2  ;;  %v6016_v3 = vpack.c.bf16 %v1536_v56, %v1535_v55 }
  0x75   : > { %5074 = vmatprep.subr.bf16.mxu1 %v5886_v23  ;;  %5122 = vmatprep.subr.bf16.mxu0 %v5893_v35  ;;  %v5925_v19 = vpack.c.bf16 %v805_v13, %v804_v10  ;;  %v5399_v2 = vld [vmem:[%s6701_s1 + $0x1f8] sm:$0xff]   ;;  %v266_v10 = vld [vmem:[%s5627_s11 + $0xd4] sm:$0x1] }
  0x76   : > { %4915 = vmatmul.mubr.bf16.gmra.mxu1 %v5895_v37  ;;  %4963 = vmatmul.mubr.bf16.gmra.mxu0 %v5897_v38  ;;  %v320_v11 = vunpack.c.l.bf16 %v266_v10  ;;  %v2629_v13 = vld [vmem:[#allocation2 + $0x38] sm:$0xff] }
  0x77   : > { %4918 = vmatprep.mubr.bf16.mxu1 %v5899_v41  ;;  %4966 = vmatprep.mubr.bf16.mxu0 %v5901_v42 }
  0x78   : > { %374 = vst [vmem:[#allocation2 + $0x1a8] sm:$0x3] %v320_v11 }
  0x7e   : > { %4919 = vmatmul.mubr.bf16.gmra.mxu1 %v5909_v57  ;;  %4967 = vmatmul.mubr.bf16.gmra.mxu0 %v5911_v58 }
  0x7f   : > { %4922 = vmatprep.mubr.bf16.mxu1 %v5913_v59  ;;  %4970 = vmatprep.mubr.bf16.mxu0 %v5915_v60 }
  0x86   : > { %4923 = vmatmul.mubr.bf16.gmra.mxu1 %v5921_v17  ;;  %4971 = vmatmul.mubr.bf16.gmra.mxu0 %v5923_v18 }
  0x87   : > { %4926 = vmatprep.mubr.bf16.mxu1 %v5925_v19  ;;  %4974 = vmatprep.mubr.bf16.mxu0 %v5927_v20 }
  0x8e   : > { %4927 = vmatmul.mubr.bf16.gmra.mxu1 %v5936_v34  ;;  %4975 = vmatmul.mubr.bf16.gmra.mxu0 %v5938_v36 }
  0x8f   : > { %4994 = vmatprep.mubr.bf16.mxu1 %v5637_v12  ;;  %5042 = vmatprep.mubr.bf16.mxu0 %v5790_v0  ;;  %v5386_v12 = vld [vmem:[%s6701_s1 + $0x168] sm:$0xff]  }
  0x90   : > { %v5387_v0 = vld [vmem:[%s6701_s1 + $0x1a8] sm:$0xff]  }
  0x96   : > { %4995 = vmatmul.mubr.bf16.vlgmr.msra.gmra.mxu1 %v5708_v63  ;;  %5043 = vmatmul.mubr.bf16.vlgmr.msra.gmra.mxu0 %v5795_v4  ;;  %v5389_v63 = vld [vmem:[%s6701_s1 + $0x1a0] sm:$0xff]   ;;  %v5390_v4 = vld [vmem:[%s6701_s1 + $0x158] sm:$0xff]  }
  0x97   : > { %5075 = vmatpush3.bf16.msra.mxu1 %v5886_v23  ;;  %5123 = vmatpush3.bf16.msra.mxu0 %v5893_v35  ;;  %v1533_v23 = vld [vmem:[#allocation2 + $0xd8] sm:$0xff]  ;;  %v1534_v35 = vld [vmem:[#allocation2 + $0xe0] sm:$0xff] }
  0x98   : > { %4998 = vmatprep.mubr.bf16.mxu1 %v5652_v25  ;;  %5046 = vmatprep.mubr.bf16.mxu0 %v5817_v26  ;;  %v5388_v25 = vld [vmem:[%s6701_s1 + $0x160] sm:$0xff]   ;;  %v5391_v26 = vld [vmem:[%s6701_s1 + $0x198] sm:$0xff]  }
  0x99   : > { %5076 = vmatprep.subr.bf16.mxu1 %v5384_v45  ;;  %5124 = vmatprep.subr.bf16.mxu0 %v5385_v46 }
  0x9b   : > { %5077 = vmatpush3.bf16.msra.mxu1 %v5384_v45  ;;  %5125 = vmatpush3.bf16.msra.mxu0 %v5385_v46  ;;  %v5403_v45 = vld [vmem:[%s6701_s1 + $0x1e8] sm:$0xff]  }
  0x9c   : > { %5078 = vmatprep.subr.bf16.mxu1 %v5386_v12  ;;  %5126 = vmatprep.subr.bf16.mxu0 %v5387_v0  ;;  %v5404_v46 = vld [vmem:[%s6701_s1 + $0x228] sm:$0xff]  }
  0x9e   : > { %4999 = vmatmul.mubr.bf16.gmra.mxu1 %v5731_v14  ;;  %5047 = vmatmul.mubr.bf16.gmra.mxu0 %v5821_v31  ;;  %v5393_v14 = vld [vmem:[%s6701_s1 + $0x190] sm:$0xff]   ;;  %v1531_v31 = vld [vmem:[#allocation2 + $0xc0] sm:$0xff] }
  0x9f   : > { %5002 = vmatprep.mubr.bf16.mxu1 %v5670_v39  ;;  %5050 = vmatprep.mubr.bf16.mxu0 %v5841_v47  ;;  %v5392_v39 = vld [vmem:[%s6701_s1 + $0x150] sm:$0xff]   ;;  %v1532_v47 = vld [vmem:[#allocation2 + $0xc8] sm:$0xff] }
  0xa0   : > { %5079 = vmatpush3.bf16.msra.mxu1 %v5386_v12  ;;  %5127 = vmatpush3.bf16.msra.mxu0 %v5387_v0  ;;  %v2664_v12 = vpack.c.bf16 %v2637_v44, %v2636_v43  ;;  %v5406_v0 = vld [vmem:[%s6701_s1 + $0x220] sm:$0xff]  }
  0xa1   : > { %5080 = vmatprep.subr.bf16.mxu1 %v5388_v25  ;;  %5128 = vmatprep.subr.bf16.mxu0 %v5389_v63 }
  0xa4   : > { %5081 = vmatpush3.bf16.msra.mxu1 %v5388_v25  ;;  %5129 = vmatpush3.bf16.msra.mxu0 %v5389_v63  ;;  %v2638_v25 = vld [vmem:[#allocation2 + $0xa8] sm:$0xff]  ;;  %v2639_v63 = vld [vmem:[#allocation2 + $0xb0] sm:$0xff] }
  0xa5   : > { %5082 = vmatprep.subr.bf16.mxu1 %v5390_v4  ;;  %5130 = vmatprep.subr.bf16.mxu0 %v5391_v26 }
  0xa6   : > { %5003 = vmatmul.mubr.bf16.gmra.mxu1 %v5756_v27  ;;  %5051 = vmatmul.mubr.bf16.gmra.mxu0 %v5845_v49  ;;  %v5395_v27 = vld [vmem:[%s6701_s1 + $0x188] sm:$0xff]   ;;  %v5996_v49 = vpack.c.bf16 %v1532_v47, %v1531_v31  ;;  %v2648_v47 = vld [vmem:[#allocation2 + $0x120] sm:$0xff] }
  0xa7   : > { %5006 = vmatprep.mubr.bf16.mxu1 %v5688_v53  ;;  %5054 = vmatprep.mubr.bf16.mxu0 %v5865_v6  ;;  %v5998_v53 = vpack.c.bf16 %v1534_v35, %v1533_v23  ;;  %v5397_v6 = vld [vmem:[%s6701_s1 + $0x140] sm:$0xff]   ;;  %v5412_v31 = vld [vmem:[%s6701_s1 + $0x208] sm:$0xff]  }
  0xa8   : > { %5083 = vmatpush3.bf16.msra.mxu1 %v5390_v4  ;;  %5131 = vmatpush3.bf16.msra.mxu0 %v5391_v26  ;;  %v5407_v4 = vld [vmem:[%s6701_s1 + $0x1d8] sm:$0xff]   ;;  %v2649_v23 = vld [vmem:[#allocation2 + $0x128] sm:$0xff] }
  0xa9   : > { %5084 = vmatprep.subr.bf16.mxu1 %v5392_v39  ;;  %5132 = vmatprep.subr.bf16.mxu0 %v5393_v14  ;;  %v5408_v26 = vld [vmem:[%s6701_s1 + $0x218] sm:$0xff]   ;;  %v2670_v35 = vpack.c.bf16 %v2649_v23, %v2648_v47 }
  0xac   : > { %5085 = vmatpush3.bf16.msra.mxu1 %v5392_v39  ;;  %5133 = vmatpush3.bf16.msra.mxu0 %v5393_v14  ;;  %v2665_v39 = vpack.c.bf16 %v2639_v63, %v2638_v25  ;;  %v5411_v14 = vld [vmem:[%s6701_s1 + $0x1c8] sm:$0xff]  }
  0xad   : > { %5086 = vmatprep.subr.bf16.mxu1 %v5394_v51  ;;  %5134 = vmatprep.subr.bf16.mxu0 %v5395_v27  ;;  %v3002_v25 = vld [vmem:[#allocation2 + $0x61] sm:$0xff] }
  0xae   : > { %5007 = vmatmul.mubr.bf16.gmra.mxu1 %v5996_v49  ;;  %5055 = vmatmul.mubr.bf16.gmra.mxu0 %v5869_v8  ;;  %v5400_v8 = vld [vmem:[%s6701_s1 + $0x238] sm:$0xff]  }
  0xaf   : > { %5010 = vmatprep.mubr.bf16.mxu1 %v5998_v53  ;;  %5058 = vmatprep.mubr.bf16.mxu0 %v5895_v37  ;;  %v6018_v37 = vpack.c.bf16 %v1538_v62, %v1537_v61 }
  0xb0   : > { %5087 = vmatpush3.bf16.msra.mxu1 %v5394_v51  ;;  %5135 = vmatpush3.bf16.msra.mxu0 %v5395_v27 }
  0xb1   : > { %5088 = vmatprep.subr.bf16.mxu1 %v5397_v6  ;;  %5136 = vmatprep.subr.bf16.mxu0 %v5398_v52 }
  0xb4   : > { %5089 = vmatpush3.bf16.msra.mxu1 %v5397_v6  ;;  %5137 = vmatpush3.bf16.msra.mxu0 %v5398_v52  ;;  %v2652_v6 = vld [vmem:[#allocation2 + $0x150] sm:$0xff]  ;;  %v2653_v52 = vld [vmem:[#allocation2 + $0x158] sm:$0xff] }
  0xb5   : > { %5170 = vmatprep.subr.bf16.mxu1 %v5399_v2  ;;  %5218 = vmatprep.subr.bf16.mxu0 %v5400_v8  ;;  %v2672_v62 = vpack.c.bf16 %v2653_v52, %v2652_v6  ;;  %v3005_v6 = vld [vmem:[#allocation2 + $0x81] sm:$0xff] }
  0xb6   : > { %5011 = vmatmul.mubr.bf16.gmra.mxu1 %v6016_v3  ;;  %5059 = vmatmul.mubr.bf16.gmra.mxu0 %v5899_v41  ;;  %v1917_v41 = vld [vmem:[#allocation2 + $0x181] sm:$0xff] }
  0xb7   : > { %5014 = vmatprep.mubr.bf16.mxu1 %v6018_v37  ;;  %5062 = vmatprep.mubr.bf16.mxu0 %v5909_v57  ;;  %v1918_v57 = vld [vmem:[#allocation2 + $0x189] sm:$0xff] }
  0xbe   : > { %5015 = vmatmul.mubr.bf16.gmra.mxu1 %v5734_v15  ;;  %5063 = vmatmul.mubr.bf16.gmra.mxu0 %v5913_v59  ;;  %v2628_v15 = vld [vmem:[#allocation2 + $0x30] sm:$0xff]  ;;  %v6034_v59 = vld [vmem:[%s5627_s11 + $0xc0] sm:$0xff] }
  0xbf   : > { %5018 = vmatprep.mubr.bf16.mxu1 %v5673_v40  ;;  %5066 = vmatprep.mubr.bf16.mxu0 %v5921_v17  ;;  %v6036_v40 = vpack.c.bf16 %v1918_v57, %v1917_v41  ;;  %v2660_v16 = vpack.c.bf16 %v2629_v13, %v2628_v15  ;;  %v2632_v17 = vld [vmem:[#allocation2 + $0x60] sm:$0xff] }
  0xc6   : > { %5019 = vmatmul.mubr.bf16.gmra.mxu1 %v5759_v29  ;;  %5067 = vmatmul.mubr.bf16.gmra.mxu0 %v5925_v19  ;;  %v2630_v29 = vld [vmem:[#allocation2 + $0x48] sm:$0xff] }
  0xc7   : > { %5022 = vmatprep.mubr.bf16.mxu1 %v5691_v54  ;;  %5070 = vmatprep.mubr.bf16.mxu0 %v5936_v34  ;;  %v2631_v54 = vld [vmem:[#allocation2 + $0x50] sm:$0xff]  ;;  %v2633_v19 = vld [vmem:[#allocation2 + $0x68] sm:$0xff]  ;;  %v2635_v34 = vld [vmem:[#allocation2 + $0x80] sm:$0xff] }
  0xc8   : > { %v2661_v21 = vpack.c.bf16 %v2631_v54, %v2630_v29  ;;  %v2662_v22 = vpack.c.bf16 %v2633_v19, %v2632_v17  ;;  %v2288_v54 = vld [vmem:[#allocation2 + $0x18a] sm:$0xff] }
  0xc9   : > { %v2998_v17 = vld [vmem:[#allocation2 + $0x31] sm:$0xff] }
  0xce   : > { %5023 = vmatmul.mubr.bf16.gmra.mxu1 %v6034_v59  ;;  %5071 = vmatmul.mubr.bf16.gmra.mxu0 %v6036_v40 }
  0xcf   : > { %5090 = vmatprep.mubr.bf16.mxu1 %v5792_v1  ;;  %5138 = vmatprep.mubr.bf16.mxu0 %v2660_v16  ;;  %v2634_v1 = vld [vmem:[#allocation2 + $0x78] sm:$0xff] }
  0xd6   : > { %5091 = vmatmul.mubr.bf16.vlgmr.msra.gmra.mxu1 %v5797_v5  ;;  %5139 = vmatmul.mubr.bf16.vlgmr.msra.gmra.mxu0 %v2661_v21  ;;  %v2663_v5 = vpack.c.bf16 %v2635_v34, %v2634_v1 }
  0xd7   : > { %5171 = vmatpush3.bf16.msra.mxu1 %v5399_v2  ;;  %5219 = vmatpush3.bf16.msra.mxu0 %v5400_v8 }
  0xd8   : > { %5094 = vmatprep.mubr.bf16.mxu1 %v5819_v28  ;;  %5142 = vmatprep.mubr.bf16.mxu0 %v2662_v22  ;;  %v5405_v28 = vld [vmem:[%s6701_s1 + $0x1e0] sm:$0xff]  }
  0xd9   : > { %5172 = vmatprep.subr.bf16.mxu1 %v5401_v24  ;;  %5220 = vmatprep.subr.bf16.mxu0 %v5402_v30  ;;  %v2999_v22 = vld [vmem:[#allocation2 + $0x39] sm:$0xff] }
  0xda   : > { %v3030_v43 = vpack.c.bf16 %v2999_v22, %v2998_v17  ;;  %v3377_v17 = vld [vmem:[#allocation2 + $0x9a] sm:$0xff] }
  0xdb   : > { %5173 = vmatpush3.bf16.msra.mxu1 %v5401_v24  ;;  %5221 = vmatpush3.bf16.msra.mxu0 %v5402_v30  ;;  %v3368_v24 = vld [vmem:[#allocation2 + $0x32] sm:$0xff]  ;;  %v3369_v30 = vld [vmem:[#allocation2 + $0x3a] sm:$0xff] }
  0xdc   : > { %5174 = vmatprep.subr.bf16.mxu1 %v5403_v45  ;;  %5222 = vmatprep.subr.bf16.mxu0 %v5404_v46 }
  0xde   : > { %5095 = vmatmul.mubr.bf16.gmra.mxu1 %v5823_v32  ;;  %5143 = vmatmul.mubr.bf16.gmra.mxu0 %v2663_v5  ;;  %v5409_v32 = vld [vmem:[%s6701_s1 + $0x1d0] sm:$0xff]  }
  0xdf   : > { %5098 = vmatprep.mubr.bf16.mxu1 %v5843_v48  ;;  %5146 = vmatprep.mubr.bf16.mxu0 %v2664_v12  ;;  %v5410_v48 = vld [vmem:[%s6701_s1 + $0x210] sm:$0xff]  }
  0xe0   : > { %5175 = vmatpush3.bf16.msra.mxu1 %v5403_v45  ;;  %5223 = vmatpush3.bf16.msra.mxu0 %v5404_v46  ;;  %v3000_v5 = vld [vmem:[#allocation2 + $0x49] sm:$0xff]  ;;  %v3001_v12 = vld [vmem:[#allocation2 + $0x51] sm:$0xff] }
  0xe1   : > { %5176 = vmatprep.subr.bf16.mxu1 %v5405_v28  ;;  %5224 = vmatprep.subr.bf16.mxu0 %v5406_v0 }
  0xe4   : > { %5177 = vmatpush3.bf16.msra.mxu1 %v5405_v28  ;;  %5225 = vmatpush3.bf16.msra.mxu0 %v5406_v0  ;;  %v3370_v28 = vld [vmem:[#allocation2 + $0x4a] sm:$0xff]  ;;  %v3371_v0 = vld [vmem:[#allocation2 + $0x52] sm:$0xff] }
  0xe5   : > { %5178 = vmatprep.subr.bf16.mxu1 %v5407_v4  ;;  %5226 = vmatprep.subr.bf16.mxu0 %v5408_v26 }
  0xe6   : > { %5099 = vmatmul.mubr.bf16.gmra.mxu1 %v5847_v50  ;;  %5147 = vmatmul.mubr.bf16.gmra.mxu0 %v2665_v39  ;;  %v5413_v50 = vld [vmem:[%s6701_s1 + $0x1c0] sm:$0xff]  }
  0xe7   : > { %5102 = vmatprep.mubr.bf16.mxu1 %v5867_v7  ;;  %5150 = vmatprep.mubr.bf16.mxu0 %v5996_v49  ;;  %v5414_v7 = vld [vmem:[%s6701_s1 + $0x200] sm:$0xff]  }
  0xe8   : > { %5179 = vmatpush3.bf16.msra.mxu1 %v5407_v4  ;;  %5227 = vmatpush3.bf16.msra.mxu0 %v5408_v26  ;;  %v3003_v26 = vld [vmem:[#allocation2 + $0x69] sm:$0xff] }
  0xe9   : > { %5180 = vmatprep.subr.bf16.mxu1 %v5409_v32  ;;  %5228 = vmatprep.subr.bf16.mxu0 %v5410_v48  ;;  %v3372_v39 = vld [vmem:[#allocation2 + $0x62] sm:$0xff] }
  0xec   : > { %5181 = vmatpush3.bf16.msra.mxu1 %v5409_v32  ;;  %5229 = vmatpush3.bf16.msra.mxu0 %v5410_v48  ;;  %v3373_v32 = vld [vmem:[#allocation2 + $0x6a] sm:$0xff] }
  0xed   : > { %5182 = vmatprep.subr.bf16.mxu1 %v5411_v14  ;;  %5230 = vmatprep.subr.bf16.mxu0 %v5412_v31 }
  0xee   : > { %5103 = vmatmul.mubr.bf16.gmra.mxu1 %v5871_v9  ;;  %5151 = vmatmul.mubr.bf16.gmra.mxu0 %v5998_v53  ;;  %v2650_v9 = vld [vmem:[#allocation2 + $0x138] sm:$0xff] }
  0xef   : > { %5106 = vmatprep.mubr.bf16.mxu1 %v5897_v38  ;;  %5154 = vmatprep.mubr.bf16.mxu0 %v6016_v3  ;;  %v2651_v38 = vld [vmem:[#allocation2 + $0x140] sm:$0xff]  ;;  %v2654_v3 = vld [vmem:[#allocation2 + $0x168] sm:$0xff] }
  0xf0   : > { %5183 = vmatpush3.bf16.msra.mxu1 %v5411_v14  ;;  %5231 = vmatpush3.bf16.msra.mxu0 %v5412_v31  ;;  %v2671_v61 = vpack.c.bf16 %v2651_v38, %v2650_v9  ;;  %v3031_v31 = vpack.c.bf16 %v3001_v12, %v3000_v5  ;;  %v3004_v38 = vld [vmem:[#allocation2 + $0x79] sm:$0xff] }
  0xf1   : > { %5184 = vmatprep.subr.bf16.mxu1 %v5413_v50  ;;  %5232 = vmatprep.subr.bf16.mxu0 %v5414_v7 }
  0xf4   : > { %5185 = vmatpush3.bf16.msra.mxu1 %v5413_v50  ;;  %5233 = vmatpush3.bf16.msra.mxu0 %v5414_v7  ;;  %v3032_v50 = vpack.c.bf16 %v3003_v26, %v3002_v25  ;;  %v3402_v7 = vpack.c.bf16 %v3373_v32, %v3372_v39 }
  0xf6   : > { %v6094_v51 = vpop.f32.mrf.mxu0  ;;  %v6096_v27 = vpop.f32.mrf.mxu1  ;;  %5107 = vmatmul.mubr.bf16.gmra.mxu1 %v5901_v42  ;;  %5155 = vmatmul.mubr.bf16.gmra.mxu0 %v6018_v37  ;;  %v2655_v37 = vld [vmem:[#allocation2 + $0x170] sm:$0xff] }
  0xf7   : > { %5110 = vmatprep.mubr.bf16.mxu1 %v5911_v58  ;;  %5158 = vmatprep.mubr.bf16.mxu0 %v2670_v35  ;;  %v2673_v15 = vpack.c.bf16 %v2655_v37, %v2654_v3  ;;  %v3006_v3 = vld [vmem:[#allocation2 + $0x91] sm:$0xff] }
  0xf8   : > { %v6101_v49 = vpop.f32.mrf.mxu0  ;;  %v6103_v53 = vpop.f32.mrf.mxu1 }
  0xfa   : > { %v6105_v55 = vpop.f32.mrf.mxu0  ;;  %v6107_v56 = vpop.f32.mrf.mxu1 }
  0xfc   : > { %v6109_v42 = vpop.f32.mrf.mxu0  ;;  %v6111_v2 = vpop.f32.mrf.mxu1 }
  0xfe   : > { %v6113_v58 = vpop.f32.mrf.mxu0  ;;  %v6115_v8 = vpop.f32.mrf.mxu1  ;;  %5111 = vmatmul.mubr.bf16.gmra.mxu1 %v5915_v60  ;;  %5159 = vmatmul.mubr.bf16.gmra.mxu0 %v2671_v61  ;;  %v3374_v61 = vld [vmem:[#allocation2 + $0x7a] sm:$0xff] }
  0xff   : > { %5114 = vmatprep.mubr.bf16.mxu1 %v5923_v18  ;;  %5162 = vmatprep.mubr.bf16.mxu0 %v2672_v62  ;;  %v2287_v18 = vld [vmem:[#allocation2 + $0x182] sm:$0xff] }
 0x100   : > { %v6119_v10 = vpop.f32.mrf.mxu0  ;;  %v6121_v11 = vpop.f32.mrf.mxu1  ;;  %v3375_v62 = vld [vmem:[#allocation2 + $0x82] sm:$0xff] }
 0x101   : > { %v3403_v5 = vpack.c.bf16 %v3375_v62, %v3374_v61  ;;  %v3011_v61 = vld [vmem:[#allocation2 + $0xc9] sm:$0xff] }
 0x102   : > { %v6123_v41 = vpop.f32.mrf.mxu0  ;;  %v6125_v57 = vpop.f32.mrf.mxu1  ;;  %v3380_v62 = vld [vmem:[#allocation2 + $0xc2] sm:$0xff] }
 0x104   : > { %v6127_v13 = vpop.f32.mrf.mxu0  ;;  %v6129_v16 = vpop.f32.mrf.mxu1 }
 0x106   : > { %v6131_v60 = vpop.f32.mrf.mxu0  ;;  %v6133_v29 = vpop.f32.mrf.mxu1  ;;  %5115 = vmatmul.mubr.bf16.gmra.mxu1 %v5927_v20  ;;  %5163 = vmatmul.mubr.bf16.gmra.mxu0 %v2673_v15  ;;  %v6146_v20 = vpack.c.bf16 %v2288_v54, %v2287_v18  ;;  %v3007_v18 = vld [vmem:[#allocation2 + $0x99] sm:$0xff] }
 0x107   : > { %5118 = vmatprep.mubr.bf16.mxu1 %v5938_v36  ;;  %5166 = vmatprep.mubr.bf16.mxu0 %v6034_v59  ;;  %v3400_v36 = vpack.c.bf16 %v3369_v30, %v3368_v24  ;;  %v3376_v54 = vld [vmem:[#allocation2 + $0x92] sm:$0xff] }
 0x108   : > { %v6138_v19 = vpop.f32.mrf.mxu0  ;;  %v6140_v21 = vpop.f32.mrf.mxu1 }
 0x10a   : > { %v6142_v1 = vpop.f32.mrf.mxu0  ;;  %v6144_v34 = vpop.f32.mrf.mxu1 }
 0x10c   : > { %v6148_v44 = vpop.f32.mrf.mxu0  ;;  %v6150_v59 = vpop.f32.mrf.mxu1 }
 0x10e   : > { %v6152_v45 = vpop.f32.mrf.mxu0  ;;  %v6154_v46 = vpop.f32.mrf.mxu1  ;;  %5119 = vmatmul.mubr.bf16.gmra.mxu1 %v6146_v20  ;;  %5167 = vmatmul.mubr.bf16.gmra.mxu0 %v5934_v33  ;;  %v3401_v33 = vpack.c.bf16 %v3371_v0, %v3370_v28  ;;  %v3034_v28 = vpack.c.bf16 %v3007_v18, %v3006_v3  ;;  %v3404_v0 = vpack.c.bf16 %v3377_v17, %v3376_v54 }
 0x10f   : > { %5186 = vmatprep.mubr.bf16.mxu1 %v3030_v43  ;;  %5234 = vmatprep.mubr.bf16.mxu0 %v3400_v36  ;;  %v3033_v36 = vpack.c.bf16 %v3005_v6, %v3004_v38  ;;  %v3010_v38 = vld [vmem:[#allocation2 + $0xc1] sm:$0xff] }
 0x110   : > { %v6158_v63 = vpop.f32.mrf.mxu0  ;;  %v6160_v4 = vpop.f32.mrf.mxu1 }
 0x112   : > { %v6162_v48 = vpop.f32.mrf.mxu0  ;;  %v6164_v14 = vpop.f32.mrf.mxu1 }
 0x114   : > { %v6166_v47 = vpop.f32.mrf.mxu0  ;;  %v6168_v23 = vpop.f32.mrf.mxu1 }
 0x116   : > { %v4900_v35 = vpop.f32.mrf.mxu1  ;;  %v4948_v9 = vpop.f32.mrf.mxu0  ;;  %5187 = vmatmul.mubr.bf16.vlgmr.msra.gmra.mxu1 %v3031_v31  ;;  %5235 = vmatmul.mubr.bf16.vlgmr.msra.gmra.mxu0 %v3401_v33 }
 0x117   : > { %v1084_v52 = vadd.f32 %v4900_v35, %v6094_v51  ;;  %5190 = vmatprep.mubr.bf16.mxu1 %v3032_v50  ;;  %5238 = vmatprep.mubr.bf16.mxu0 %v3402_v7  ;;  %v3009_v50 = vld [vmem:[#allocation2 + $0xb1] sm:$0xff] }
 0x118   : > { %v955_v37 = vpop.f32.mrf.mxu1  ;;  %v1325_v15 = vpop.f32.mrf.mxu0 }
 0x119   : > { %v6171_v22 = vadd.f32 %v4948_v9, %v1084_v52  ;;  %v1082_v24 = vadd.f32 %v955_v37, %v6101_v49  ;;  %v3008_v49 = vld [vmem:[#allocation2 + $0xa9] sm:$0xff]  ;;  %v3379_v9 = vld [vmem:[#allocation2 + $0xb2] sm:$0xff] }
 0x11a   : > { %v4901_v30 = vpop.f32.mrf.mxu1  ;;  %v4949_v43 = vpop.f32.mrf.mxu0  ;;  %v3035_v54 = vpack.c.bf16 %v3009_v50, %v3008_v49  ;;  %v3014_v49 = vld [vmem:[#allocation2 + $0xf1] sm:$0xff] }
 0x11b   : > { %v6174_v12 = vadd.f32 %v1325_v15, %v1082_v24  ;;  %v1085_v51 = vadd.f32 %v4901_v30, %v6105_v55  ;;  %v3378_v55 = vld [vmem:[#allocation2 + $0xaa] sm:$0xff]  ;;  %v3036_v30 = vpack.c.bf16 %v3011_v61, %v3010_v38 }
 0x11c   : > { %v958_v25 = vpop.f32.mrf.mxu1  ;;  %v1328_v26 = vpop.f32.mrf.mxu0  ;;  %v3405_v17 = vpack.c.bf16 %v3379_v9, %v3378_v55  ;;  %v3015_v55 = vld [vmem:[#allocation2 + $0xf9] sm:$0xff] }
 0x11d   : > { %v6177_v39 = vadd.f32 %v4949_v43, %v1085_v51  ;;  %v1083_v32 = vadd.f32 %v958_v25, %v6109_v42  ;;  %v3381_v42 = vld [vmem:[#allocation2 + $0xca] sm:$0xff]  ;;  %v3384_v9 = vld [vmem:[#allocation2 + $0xf2] sm:$0xff] }
 0x11e   : > { %v4904_v31 = vpop.f32.mrf.mxu1  ;;  %v4952_v33 = vpop.f32.mrf.mxu0  ;;  %5191 = vmatmul.mubr.bf16.gmra.mxu1 %v3033_v36  ;;  %5239 = vmatmul.mubr.bf16.gmra.mxu0 %v3403_v5  ;;  %v3406_v43 = vpack.c.bf16 %v3381_v42, %v3380_v62 }
 0x11f   : > { %v6180_v7 = vadd.f32 %v1328_v26, %v1083_v32  ;;  %v1088_v35 = vadd.f32 %v4904_v31, %v6113_v58  ;;  %5194 = vmatprep.mubr.bf16.mxu1 %v3034_v28  ;;  %5242 = vmatprep.mubr.bf16.mxu0 %v3404_v0  ;;  %v3013_v26 = vld [vmem:[#allocation2 + $0xe1] sm:$0xff] }
 0x120   : > { %v971_v6 = vpop.f32.mrf.mxu1  ;;  %v1341_v52 = vpop.f32.mrf.mxu0 }
 0x121   : > { %v6183_v3 = vadd.f32 %v4952_v33, %v1088_v35  ;;  %v1086_v37 = vadd.f32 %v971_v6, %v6119_v10  ;;  %v3012_v10 = vld [vmem:[#allocation2 + $0xd9] sm:$0xff]  ;;  %v3383_v33 = vld [vmem:[#allocation2 + $0xe2] sm:$0xff] }
 0x122   : > { %v4905_v15 = vpop.f32.mrf.mxu1  ;;  %v4953_v18 = vpop.f32.mrf.mxu0  ;;  %v3037_v62 = vpack.c.bf16 %v3013_v26, %v3012_v10  ;;  %v3018_v10 = vld [vmem:[#allocation2 + $0x121] sm:$0xff] }
 0x123   : > { %v6186_v24 = vadd.f32 %v1341_v52, %v1086_v37  ;;  %v1089_v58 = vadd.f32 %v4905_v15, %v6123_v41  ;;  %v3382_v41 = vld [vmem:[#allocation2 + $0xda] sm:$0xff]  ;;  %v3038_v15 = vpack.c.bf16 %v3015_v55, %v3014_v49 }
 0x124   : > { %v974_v36 = vpop.f32.mrf.mxu1  ;;  %v1344_v5 = vpop.f32.mrf.mxu0  ;;  %v3407_v42 = vpack.c.bf16 %v3383_v33, %v3382_v41  ;;  %v3019_v41 = vld [vmem:[#allocation2 + $0x129] sm:$0xff] }
 0x125   : > { %v6189_v51 = vadd.f32 %v4953_v18, %v1089_v58  ;;  %v1087_v28 = vadd.f32 %v974_v36, %v6127_v13  ;;  %v3385_v13 = vld [vmem:[#allocation2 + $0xfa] sm:$0xff]  ;;  %v3388_v33 = vld [vmem:[#allocation2 + $0x122] sm:$0xff] }
 0x126   : > { %v4908_v0 = vpop.f32.mrf.mxu1  ;;  %v4956_v25 = vpop.f32.mrf.mxu0  ;;  %5195 = vmatmul.mubr.bf16.gmra.mxu1 %v3035_v54  ;;  %5243 = vmatmul.mubr.bf16.gmra.mxu0 %v3405_v17  ;;  %v3408_v18 = vpack.c.bf16 %v3385_v13, %v3384_v9 }
 0x127   : > { %v6192_v32 = vadd.f32 %v1344_v5, %v1087_v28  ;;  %v1092_v31 = vadd.f32 %v4908_v0, %v6131_v60  ;;  %5198 = vmatprep.mubr.bf16.mxu1 %v3036_v30  ;;  %5246 = vmatprep.mubr.bf16.mxu0 %v3406_v43  ;;  %v3017_v5 = vld [vmem:[#allocation2 + $0x111] sm:$0xff] }
 0x128   : > { %v987_v50 = vpop.f32.mrf.mxu1  ;;  %v1357_v35 = vpop.f32.mrf.mxu0 }
 0x129   : > { %v6195_v38 = vadd.f32 %v4956_v25, %v1092_v31  ;;  %v1090_v6 = vadd.f32 %v987_v50, %v6138_v19  ;;  %v3016_v19 = vld [vmem:[#allocation2 + $0x109] sm:$0xff]  ;;  %v3387_v25 = vld [vmem:[#allocation2 + $0x112] sm:$0xff] }
 0x12a   : > { %v4909_v52 = vpop.f32.mrf.mxu1  ;;  %v4957_v61 = vpop.f32.mrf.mxu0  ;;  %v3039_v9 = vpack.c.bf16 %v3017_v5, %v3016_v19  ;;  %v3022_v19 = vld [vmem:[#allocation2 + $0x151] sm:$0xff] }
 0x12b   : > { %v6198_v37 = vadd.f32 %v1357_v35, %v1090_v6  ;;  %v1093_v60 = vadd.f32 %v4909_v52, %v6142_v1  ;;  %v3386_v1 = vld [vmem:[#allocation2 + $0x10a] sm:$0xff]  ;;  %v3040_v52 = vpack.c.bf16 %v3019_v41, %v3018_v10 }
 0x12c   : > { %v990_v54 = vpop.f32.mrf.mxu1  ;;  %v1360_v17 = vpop.f32.mrf.mxu0  ;;  %v3409_v13 = vpack.c.bf16 %v3387_v25, %v3386_v1  ;;  %v3023_v1 = vld [vmem:[#allocation2 + $0x159] sm:$0xff] }
 0x12d   : > { %v6201_v58 = vadd.f32 %v4957_v61, %v1093_v60  ;;  %v1091_v30 = vadd.f32 %v990_v54, %v6148_v44  ;;  %v3389_v44 = vld [vmem:[#allocation2 + $0x12a] sm:$0xff]  ;;  %v3392_v25 = vld [vmem:[#allocation2 + $0x152] sm:$0xff] }
 0x12e   : > { %v4912_v43 = vpop.f32.mrf.mxu1  ;;  %v4960_v36 = vpop.f32.mrf.mxu0  ;;  %5199 = vmatmul.mubr.bf16.gmra.mxu1 %v3037_v62  ;;  %5247 = vmatmul.mubr.bf16.gmra.mxu0 %v3407_v42  ;;  %v3410_v61 = vpack.c.bf16 %v3389_v44, %v3388_v33 }
 0x12f   : > { %v6204_v28 = vadd.f32 %v1360_v17, %v1091_v30  ;;  %v1096_v0 = vadd.f32 %v4912_v43, %v6152_v45  ;;  %5202 = vmatprep.mubr.bf16.mxu1 %v3038_v15  ;;  %5250 = vmatprep.mubr.bf16.mxu0 %v3408_v18  ;;  %v3021_v17 = vld [vmem:[#allocation2 + $0x141] sm:$0xff] }
 0x130   : > { %v1003_v26 = vpop.f32.mrf.mxu1  ;;  %v1373_v31 = vpop.f32.mrf.mxu0 }
 0x131   : > { %v6207_v49 = vadd.f32 %v4960_v36, %v1096_v0  ;;  %v1094_v50 = vadd.f32 %v1003_v26, %v6158_v63  ;;  %v3020_v63 = vld [vmem:[#allocation2 + $0x139] sm:$0xff]  ;;  %v3391_v36 = vld [vmem:[#allocation2 + $0x142] sm:$0xff] }
 0x132   : > { %v4913_v35 = vpop.f32.mrf.mxu1  ;;  %v4961_v55 = vpop.f32.mrf.mxu0  ;;  %v3041_v33 = vpack.c.bf16 %v3021_v17, %v3020_v63 }
 0x133   : > { %v6210_v6 = vadd.f32 %v1373_v31, %v1094_v50  ;;  %v1097_v45 = vadd.f32 %v4913_v35, %v6162_v48  ;;  %v3390_v48 = vld [vmem:[#allocation2 + $0x13a] sm:$0xff]  ;;  %v3042_v35 = vpack.c.bf16 %v3023_v1, %v3022_v19 }
 0x134   : > { %v1006_v62 = vpop.f32.mrf.mxu1  ;;  %v1376_v42 = vpop.f32.mrf.mxu0  ;;  %v3411_v44 = vpack.c.bf16 %v3391_v36, %v3390_v48 }
 0x135   : > { %v6213_v60 = vadd.f32 %v4961_v55, %v1097_v45  ;;  %v1095_v15 = vadd.f32 %v1006_v62, %v6166_v47  ;;  %v3393_v47 = vld [vmem:[#allocation2 + $0x15a] sm:$0xff] }
 0x136   : > { %v4916_v18 = vpop.f32.mrf.mxu1  ;;  %v4964_v54 = vpop.f32.mrf.mxu0  ;;  %5203 = vmatmul.mubr.bf16.gmra.mxu1 %v3039_v9  ;;  %5251 = vmatmul.mubr.bf16.gmra.mxu0 %v3409_v13  ;;  %v3412_v55 = vpack.c.bf16 %v3393_v47, %v3392_v25 }
 0x137   : > { %v6216_v30 = vadd.f32 %v1376_v42, %v1095_v15  ;;  %v1100_v43 = vadd.f32 %v4916_v18, %v6096_v27  ;;  %5206 = vmatprep.mubr.bf16.mxu1 %v3040_v52  ;;  %5254 = vmatprep.mubr.bf16.mxu0 %v3410_v61  ;;  %v3394_v18 = vld [vmem:[#allocation2 + $0x16a] sm:$0xff] }
 0x138   : > { %v1019_v5 = vpop.f32.mrf.mxu1  ;;  %v1389_v0 = vpop.f32.mrf.mxu0 }
 0x139   : > { %v6219_v10 = vadd.f32 %v4964_v54, %v1100_v43  ;;  %v1098_v26 = vadd.f32 %v1019_v5, %v6103_v53  ;;  %v3024_v53 = vld [vmem:[#allocation2 + $0x169] sm:$0xff]  ;;  %v3395_v54 = vld [vmem:[#allocation2 + $0x172] sm:$0xff] }
 0x13a   : > { %v4917_v31 = vpop.f32.mrf.mxu1  ;;  %v4965_v41 = vpop.f32.mrf.mxu0  ;;  %v3413_v5 = vpack.c.bf16 %v3395_v54, %v3394_v18 }
 0x13b   : > { %v6222_v50 = vadd.f32 %v1389_v0, %v1098_v26  ;;  %v1101_v27 = vadd.f32 %v4917_v31, %v6107_v56  ;;  %v3025_v56 = vld [vmem:[#allocation2 + $0x171] sm:$0xff] }
 0x13c   : > { %v1022_v9 = vpop.f32.mrf.mxu1  ;;  %v1392_v13 = vpop.f32.mrf.mxu0  ;;  %v3043_v19 = vpack.c.bf16 %v3025_v56, %v3024_v53 }
 0x13d   : > { %v6225_v45 = vadd.f32 %v4965_v41, %v1101_v27  ;;  %v1099_v52 = vadd.f32 %v1022_v9, %v6111_v2  ;;  %v3398_v27 = vld [vmem:[#allocation2 + $0x19a] sm:$0xff] }
 0x13e   : > { %v4920_v61 = vpop.f32.mrf.mxu1  ;;  %v4968_v62 = vpop.f32.mrf.mxu0  ;;  %5207 = vmatmul.mubr.bf16.gmra.mxu1 %v3041_v33  ;;  %5255 = vmatmul.mubr.bf16.gmra.mxu0 %v3411_v44  ;;  %v3028_v33 = vld [vmem:[#allocation2 + $0x199] sm:$0xff] }
 0x13f   : > { %v6228_v42 = vadd.f32 %v1392_v13, %v1099_v52  ;;  %v1104_v15 = vadd.f32 %v4920_v61, %v6115_v8  ;;  %5210 = vmatprep.mubr.bf16.mxu1 %v3042_v35  ;;  %5258 = vmatprep.mubr.bf16.mxu0 %v3412_v55  ;;  %v3399_v35 = vld [vmem:[#allocation2 + $0x1a2] sm:$0xff] }
 0x140   : > { %v1035_v63 = vpop.f32.mrf.mxu1  ;;  %v1405_v17 = vpop.f32.mrf.mxu0  ;;  %v3415_v53 = vpack.c.bf16 %v3399_v35, %v3398_v27 }
 0x141   : > { %v6231_v43 = vadd.f32 %v4968_v62, %v1104_v15  ;;  %v1102_v2 = vadd.f32 %v1035_v63, %v6121_v11 }
 0x142   : > { %v4921_v48 = vpop.f32.mrf.mxu1  ;;  %v4969_v36 = vpop.f32.mrf.mxu0 }
 0x143   : > { %v6234_v0 = vadd.f32 %v1405_v17, %v1102_v2  ;;  %v1105_v1 = vadd.f32 %v4921_v48, %v6125_v57  ;;  %v3029_v57 = vld [vmem:[#allocation2 + $0x1a1] sm:$0xff] }
 0x144   : > { %v1038_v8 = vpop.f32.mrf.mxu1  ;;  %v1408_v25 = vpop.f32.mrf.mxu0  ;;  %v3045_v62 = vpack.c.bf16 %v3029_v57, %v3028_v33 }
 0x145   : > { %v6237_v47 = vadd.f32 %v4969_v36, %v1105_v1  ;;  %v1103_v26 = vadd.f32 %v1038_v8, %v6129_v16 }
 0x146   : > { %v4924_v31 = vpop.f32.mrf.mxu1  ;;  %v4972_v41 = vpop.f32.mrf.mxu0  ;;  %5211 = vmatmul.mubr.bf16.gmra.mxu1 %v3043_v19  ;;  %5259 = vmatmul.mubr.bf16.gmra.mxu0 %v3413_v5 }
 0x147   : > { %v6240_v11 = vadd.f32 %v1408_v25, %v1103_v26  ;;  %v1108_v44 = vadd.f32 %v4924_v31, %v6133_v29  ;;  %5214 = vmatprep.mubr.bf16.mxu1 %v6036_v40  ;;  %5262 = vmatprep.mubr.bf16.mxu0 %v6146_v20 }
 0x148   : > { %v1051_v55 = vpop.f32.mrf.mxu1  ;;  %v1421_v9 = vpop.f32.mrf.mxu0 }
 0x149   : > { %v6245_v13 = vadd.f32 %v4972_v41, %v1108_v44  ;;  %v1106_v16 = vadd.f32 %v1051_v55, %v6140_v21 }
 0x14a   : > { %v4925_v52 = vpop.f32.mrf.mxu1  ;;  %v4973_v61 = vpop.f32.mrf.mxu0 }
 0x14b   : > { %v6248_v15 = vadd.f32 %v1421_v9, %v1106_v16  ;;  %v1109_v29 = vadd.f32 %v4925_v52, %v6144_v34 }
 0x14c   : > { %v1054_v40 = vpop.f32.mrf.mxu1  ;;  %v1424_v56 = vpop.f32.mrf.mxu0 }
 0x14d   : > { %v6251_v20 = vadd.f32 %v4973_v61, %v1109_v29  ;;  %v1107_v18 = vadd.f32 %v1054_v40, %v6150_v59 }
 0x14e   : > { %v4928_v54 = vpop.f32.mrf.mxu1  ;;  %v4976_v63 = vpop.f32.mrf.mxu0  ;;  %5215 = vmatmul.mubr.bf16.gmra.mxu1 %v3045_v62  ;;  %5263 = vmatmul.mubr.bf16.gmra.mxu0 %v3415_v53 }
 0x14f   : > { %v6254_v17 = vadd.f32 %v1424_v56, %v1107_v18  ;;  %v1112_v21 = vadd.f32 %v4928_v54, %v6154_v46 }
 0x150   : > { %v1067_v2 = vpop.f32.mrf.mxu1  ;;  %v1437_v48 = vpop.f32.mrf.mxu0 }
 0x151   : > { %v6257_v36 = vadd.f32 %v4976_v63, %v1112_v21  ;;  %v1110_v34 = vadd.f32 %v1067_v2, %v6160_v4 }
 0x152   : > { %v4929_v19 = vpop.f32.mrf.mxu1  ;;  %v4977_v5 = vpop.f32.mrf.mxu0 }
 0x153   : > { %v6260_v1 = vadd.f32 %v1437_v48, %v1110_v34  ;;  %v1113_v59 = vadd.f32 %v4929_v19, %v6164_v14 }
 0x154   : > { %v1070_v8 = vpop.f32.mrf.mxu1  ;;  %v1440_v25 = vpop.f32.mrf.mxu0 }
 0x155   : > { %v6263_v26 = vadd.f32 %v4977_v5, %v1113_v59  ;;  %v1111_v31 = vadd.f32 %v1070_v8, %v6168_v23 }
 0x156   : > { %v4996_v41 = vpop.f32.mrf.mxu1  ;;  %v5044_v46 = vpop.f32.mrf.mxu0 }
 0x157   : > { %v6266_v33 = vadd.f32 %v1440_v25, %v1111_v31  ;;  %v1825_v44 = vadd.f32 %v4996_v41, %v6171_v22 }
 0x158   : > { %v1696_v57 = vpop.f32.mrf.mxu1  ;;  %v2066_v4 = vpop.f32.mrf.mxu0 }
 0x159   : > { %v6269_v27 = vadd.f32 %v5044_v46, %v1825_v44  ;;  %v1823_v35 = vadd.f32 %v1696_v57, %v6174_v12 }
 0x15a   : > { %v4997_v55 = vpop.f32.mrf.mxu1  ;;  %v5045_v14 = vpop.f32.mrf.mxu0 }
 0x15b   : > { %v6272_v9 = vadd.f32 %v2066_v4, %v1823_v35  ;;  %v1826_v16 = vadd.f32 %v4997_v55, %v6177_v39 }
 0x15c   : > { %v1699_v52 = vpop.f32.mrf.mxu1  ;;  %v2069_v23 = vpop.f32.mrf.mxu0 }
 0x15d   : > { %v6275_v61 = vadd.f32 %v5045_v14, %v1826_v16  ;;  %v1824_v62 = vadd.f32 %v1699_v52, %v6180_v7 }
 0x15e   : > { %v5000_v53 = vpop.f32.mrf.mxu1  ;;  %v5048_v22 = vpop.f32.mrf.mxu0 }
 0x15f   : > { %v6278_v29 = vadd.f32 %v2069_v23, %v1824_v62  ;;  %v1829_v40 = vadd.f32 %v5000_v53, %v6183_v3 }
 0x160   : > { %v1712_v56 = vpop.f32.mrf.mxu1  ;;  %v2082_v12 = vpop.f32.mrf.mxu0 }
 0x161   : > { %v6281_v18 = vadd.f32 %v5048_v22, %v1829_v40  ;;  %v1827_v54 = vadd.f32 %v1712_v56, %v6186_v24 }
 0x162   : > { %v5001_v63 = vpop.f32.mrf.mxu1  ;;  %v5049_v39 = vpop.f32.mrf.mxu0 }
 0x163   : > { %v6284_v21 = vadd.f32 %v2082_v12, %v1827_v54  ;;  %v1830_v2 = vadd.f32 %v5001_v63, %v6189_v51 }
 0x164   : > { %v1715_v48 = vpop.f32.mrf.mxu1  ;;  %v2085_v7 = vpop.f32.mrf.mxu0 }
 0x165   : > { %v6287_v34 = vadd.f32 %v5049_v39, %v1830_v2  ;;  %v1828_v19 = vadd.f32 %v1715_v48, %v6192_v32 }
 0x166   : > { %v5004_v5 = vpop.f32.mrf.mxu1  ;;  %v5052_v3 = vpop.f32.mrf.mxu0 }
 0x167   : > { %v6290_v59 = vadd.f32 %v2085_v7, %v1828_v19  ;;  %v1833_v8 = vadd.f32 %v5004_v5, %v6195_v38 }
 0x168   : > { %v1728_v25 = vpop.f32.mrf.mxu1  ;;  %v2098_v24 = vpop.f32.mrf.mxu0 }
 0x169   : > { %v6293_v31 = vadd.f32 %v5052_v3, %v1833_v8  ;;  %v1831_v41 = vadd.f32 %v1728_v25, %v6198_v37 }
 0x16a   : > { %v5005_v46 = vpop.f32.mrf.mxu1  ;;  %v5053_v51 = vpop.f32.mrf.mxu0 }
 0x16b   : > { %v6296_v44 = vadd.f32 %v2098_v24, %v1831_v41  ;;  %v1834_v57 = vadd.f32 %v5005_v46, %v6201_v58 }
 0x16c   : > { %v1731_v4 = vpop.f32.mrf.mxu1  ;;  %v2101_v32 = vpop.f32.mrf.mxu0 }
 0x16d   : > { %v6299_v35 = vadd.f32 %v5053_v51, %v1834_v57  ;;  %v1832_v55 = vadd.f32 %v1731_v4, %v6204_v28 }
 0x16e   : > { %v5008_v14 = vpop.f32.mrf.mxu1  ;;  %v5056_v38 = vpop.f32.mrf.mxu0 }
 0x16f   : > { %v6302_v16 = vadd.f32 %v2101_v32, %v1832_v55  ;;  %v1837_v52 = vadd.f32 %v5008_v14, %v6207_v49 }
 0x170   : > { %v1744_v23 = vpop.f32.mrf.mxu1  ;;  %v2114_v37 = vpop.f32.mrf.mxu0 }
 0x171   : > { %v6305_v62 = vadd.f32 %v5056_v38, %v1837_v52  ;;  %v1835_v53 = vadd.f32 %v1744_v23, %v6210_v6 }
 0x172   : > { %v5009_v22 = vpop.f32.mrf.mxu1  ;;  %v5057_v58 = vpop.f32.mrf.mxu0 }
 0x173   : > { %v6308_v40 = vadd.f32 %v2114_v37, %v1835_v53  ;;  %v1838_v56 = vadd.f32 %v5009_v22, %v6213_v60 }
 0x174   : > { %v1747_v12 = vpop.f32.mrf.mxu1  ;;  %v2117_v28 = vpop.f32.mrf.mxu0 }
 0x175   : > { %v6311_v54 = vadd.f32 %v5057_v58, %v1838_v56  ;;  %v1836_v63 = vadd.f32 %v1747_v12, %v6216_v30 }
 0x176   : > { %v5012_v39 = vpop.f32.mrf.mxu1  ;;  %v5060_v49 = vpop.f32.mrf.mxu0 }
 0x177   : > { %v6314_v2 = vadd.f32 %v2117_v28, %v1836_v63  ;;  %v1841_v48 = vadd.f32 %v5012_v39, %v6219_v10 }
 0x178   : > { %v1760_v7 = vpop.f32.mrf.mxu1  ;;  %v2130_v6 = vpop.f32.mrf.mxu0 }
 0x179   : > { %v6317_v19 = vadd.f32 %v5060_v49, %v1841_v48  ;;  %v1839_v5 = vadd.f32 %v1760_v7, %v6222_v50 }
 0x17a   : > { %v5013_v3 = vpop.f32.mrf.mxu1  ;;  %v5061_v60 = vpop.f32.mrf.mxu0 }
 0x17b   : > { %v6320_v8 = vadd.f32 %v2130_v6, %v1839_v5  ;;  %v1842_v25 = vadd.f32 %v5013_v3, %v6225_v45 }
 0x17c   : > { %v1763_v24 = vpop.f32.mrf.mxu1  ;;  %v2133_v30 = vpop.f32.mrf.mxu0 }
 0x17d   : > { %v6323_v41 = vadd.f32 %v5061_v60, %v1842_v25  ;;  %v1840_v46 = vadd.f32 %v1763_v24, %v6228_v42 }
 0x17e   : > { %v5016_v51 = vpop.f32.mrf.mxu1  ;;  %v5064_v10 = vpop.f32.mrf.mxu0 }
 0x17f   : > { %v6326_v57 = vadd.f32 %v2133_v30, %v1840_v46  ;;  %v1845_v4 = vadd.f32 %v5016_v51, %v6231_v43 }
 0x180   : > { %v1776_v32 = vpop.f32.mrf.mxu1  ;;  %v2146_v50 = vpop.f32.mrf.mxu0 }
 0x181   : > { %v6329_v55 = vadd.f32 %v5064_v10, %v1845_v4  ;;  %v1843_v14 = vadd.f32 %v1776_v32, %v6234_v0 }
 0x182   : > { %v5017_v38 = vpop.f32.mrf.mxu1  ;;  %v5065_v45 = vpop.f32.mrf.mxu0 }
 0x183   : > { %v6332_v52 = vadd.f32 %v2146_v50, %v1843_v14  ;;  %v1846_v23 = vadd.f32 %v5017_v38, %v6237_v47 }
 0x184   : > { %v1779_v37 = vpop.f32.mrf.mxu1  ;;  %v2149_v42 = vpop.f32.mrf.mxu0 }
 0x185   : > { %6707 = vst [vmem:[#allocation11_spill] sm:$0xff] %v6332_v52  ;;  %v6335_v53 = vadd.f32 %v5065_v45, %v1846_v23  ;;  %v1844_v22 = vadd.f32 %v1779_v37, %v6240_v11 }
 0x186   : > { %v5020_v58 = vpop.f32.mrf.mxu1  ;;  %v5068_v43 = vpop.f32.mrf.mxu0 }
 0x187   : > { %6708 = vst [vmem:[#allocation12_spill] sm:$0xff] %v6335_v53  ;;  %v6338_v56 = vadd.f32 %v2149_v42, %v1844_v22  ;;  %v1849_v12 = vadd.f32 %v5020_v58, %v6245_v13 }
 0x188   : > { %v1792_v28 = vpop.f32.mrf.mxu1  ;;  %v2162_v0 = vpop.f32.mrf.mxu0 }
 0x189   : > { %6709 = vst [vmem:[#allocation13_spill] sm:$0xff] %v6338_v56  ;;  %v6341_v63 = vadd.f32 %v5068_v43, %v1849_v12  ;;  %v1847_v39 = vadd.f32 %v1792_v28, %v6248_v15 }
 0x18a   : > { %v5021_v49 = vpop.f32.mrf.mxu1  ;;  %v5069_v47 = vpop.f32.mrf.mxu0 }
 0x18b   : > { %v6344_v48 = vadd.f32 %v2162_v0, %v1847_v39  ;;  %v1850_v7 = vadd.f32 %v5021_v49, %v6251_v20 }
 0x18c   : > { %v1795_v6 = vpop.f32.mrf.mxu1  ;;  %v2165_v11 = vpop.f32.mrf.mxu0 }
 0x18d   : > { %6710 = vst [vmem:[#allocation14_spill] sm:$0xff] %v6344_v48  ;;  %v6347_v5 = vadd.f32 %v5069_v47, %v1850_v7  ;;  %v1848_v3 = vadd.f32 %v1795_v6, %v6254_v17 }
 0x18e   : > { %v5024_v60 = vpop.f32.mrf.mxu1  ;;  %v5072_v13 = vpop.f32.mrf.mxu0 }
 0x18f   : > { %6711 = vst [vmem:[#allocation15_spill] sm:$0xff] %v6347_v5  ;;  %v6350_v25 = vadd.f32 %v2165_v11, %v1848_v3  ;;  %v1853_v24 = vadd.f32 %v5024_v60, %v6257_v36 }
 0x190   : > { %v1808_v30 = vpop.f32.mrf.mxu1  ;;  %v2178_v15 = vpop.f32.mrf.mxu0 }
 0x191   : > { %6712 = vst [vmem:[#allocation16_spill] sm:$0xff] %v6350_v25  ;;  %v6353_v46 = vadd.f32 %v5072_v13, %v1853_v24  ;;  %v1851_v51 = vadd.f32 %v1808_v30, %v6260_v1 }
 0x192   : > { %v5025_v10 = vpop.f32.mrf.mxu1  ;;  %v5073_v20 = vpop.f32.mrf.mxu0 }
 0x193   : > { %v6356_v4 = vadd.f32 %v2178_v15, %v1851_v51  ;;  %v1854_v32 = vadd.f32 %v5025_v10, %v6263_v26 }
 0x194   : > { %v1811_v50 = vpop.f32.mrf.mxu1  ;;  %v2181_v17 = vpop.f32.mrf.mxu0 }
 0x195   : > { %6713 = vst [vmem:[#allocation17_spill] sm:$0xff] %v6356_v4  ;;  %v6359_v14 = vadd.f32 %v5073_v20, %v1854_v32  ;;  %v1852_v38 = vadd.f32 %v1811_v50, %v6266_v33 }
 0x196   : > { %v5092_v45 = vpop.f32.mrf.mxu1  ;;  %v5140_v36 = vpop.f32.mrf.mxu0 }
 0x197   : > { %6714 = vst [vmem:[#allocation18_spill] sm:$0xff] %v6359_v14  ;;  %v6362_v23 = vadd.f32 %v2181_v17, %v1852_v38  ;;  %v2565_v37 = vadd.f32 %v5092_v45, %v6269_v27 }
 0x198   : > { %v2436_v42 = vpop.f32.mrf.mxu1  ;;  %v2807_v1 = vpop.f32.mrf.mxu0 }
 0x199   : > { %6715 = vst [vmem:[#allocation19_spill] sm:$0xff] %v6362_v23  ;;  %v6365_v22 = vadd.f32 %v5140_v36, %v2565_v37  ;;  %v2563_v58 = vadd.f32 %v2436_v42, %v6272_v9 }
 0x19a   : > { %v6368_v43 = vpop.f32.mrf.mxu1  ;;  %v6370_v26 = vpop.f32.mrf.mxu0 }
 0x19b   : > { %v6372_v12 = vadd.f32 %v2807_v1, %v2563_v58 }
 0x19c   : > { %v6374_v28 = vpop.f32.mrf.mxu1  ;;  %v6376_v33 = vpop.f32.mrf.mxu0 }
 0x19e   : > { %v5096_v0 = vpop.f32.mrf.mxu1  ;;  %v5144_v39 = vpop.f32.mrf.mxu0 }
 0x19f   : > { %v2569_v27 = vadd.f32 %v5096_v0, %v6281_v18 }
 0x1a0   : > { %v6379_v49 = vpop.f32.mrf.mxu1  ;;  %v6381_v47 = vpop.f32.mrf.mxu0 }
 0x1a1   : > { %v6383_v7 = vadd.f32 %v5144_v39, %v2569_v27 }
 0x1a2   : > { %v6385_v9 = vpop.f32.mrf.mxu1  ;;  %v6387_v6 = vpop.f32.mrf.mxu0 }
 0x1a4   : > { %v6389_v11 = vpop.f32.mrf.mxu1  ;;  %v6391_v3 = vpop.f32.mrf.mxu0 }
 0x1a6   : > { %v5100_v60 = vpop.f32.mrf.mxu1  ;;  %v5148_v13 = vpop.f32.mrf.mxu0 }
 0x1a7   : > { %v2573_v24 = vadd.f32 %v5100_v60, %v6293_v31 }
 0x1a8   : > { %v6394_v30 = vpop.f32.mrf.mxu1  ;;  %v6396_v18 = vpop.f32.mrf.mxu0 }
 0x1a9   : > { %v6398_v15 = vadd.f32 %v5148_v13, %v2573_v24 }
 0x1aa   : > { %v6400_v51 = vpop.f32.mrf.mxu1  ;;  %v6402_v10 = vpop.f32.mrf.mxu0 }
 0x1ac   : > { %v6404_v20 = vpop.f32.mrf.mxu1  ;;  %v6406_v32 = vpop.f32.mrf.mxu0 }
 0x1ae   : > { %v5104_v50 = vpop.f32.mrf.mxu1  ;;  %v5152_v17 = vpop.f32.mrf.mxu0 }
 0x1af   : > { %v2577_v38 = vadd.f32 %v5104_v50, %v6305_v62 }
 0x1b0   : > { %v6409_v45 = vpop.f32.mrf.mxu1  ;;  %v6411_v31 = vpop.f32.mrf.mxu0 }
 0x1b1   : > { %v6413_v36 = vadd.f32 %v5152_v17, %v2577_v38 }
 0x1b2   : > { %v6415_v37 = vpop.f32.mrf.mxu1  ;;  %v6417_v42 = vpop.f32.mrf.mxu0 }
 0x1b4   : > { %v6419_v1 = vpop.f32.mrf.mxu1  ;;  %v6421_v58 = vpop.f32.mrf.mxu0 }
 0x1b6   : > { %v5108_v0 = vpop.f32.mrf.mxu1  ;;  %v5156_v39 = vpop.f32.mrf.mxu0 }
 0x1b7   : > { %v2581_v27 = vadd.f32 %v5108_v0, %v6317_v19 }
 0x1b8   : > { %v6424_v60 = vpop.f32.mrf.mxu1  ;;  %v6426_v62 = vpop.f32.mrf.mxu0 }
 0x1b9   : > { %v6428_v13 = vadd.f32 %v5156_v39, %v2581_v27 }
 0x1ba   : > { %v6430_v24 = vpop.f32.mrf.mxu1  ;;  %v6432_v50 = vpop.f32.mrf.mxu0 }
 0x1bc   : > { %v6434_v17 = vpop.f32.mrf.mxu1  ;;  %v6436_v38 = vpop.f32.mrf.mxu0 }
 0x1bd   : > { %6716 = vst [vmem:[#allocation20_spill] sm:$0xff] %v6436_v38 }
 0x1be   : > { %v5112_v23 = vpop.f32.mrf.mxu1  ;;  %v5160_v14 = vpop.f32.mrf.mxu0 }
 0x1bf   : > { %v2585_v4 = vadd.f32 %v5112_v23, %v6329_v55 }
 0x1c0   : > { %v6439_v25 = vpop.f32.mrf.mxu1  ;;  %v6441_v19 = vpop.f32.mrf.mxu0 }
 0x1c1   : > { %6717 = vst [vmem:[#allocation21_spill] sm:$0xff] %v6441_v19  ;;  %v6443_v0 = vadd.f32 %v5160_v14, %v2585_v4 }
 0x1c2   : > { %v6445_v39 = vpop.f32.mrf.mxu1  ;;  %v6447_v27 = vpop.f32.mrf.mxu0 }
 0x1c3   : > { %6718 = vst [vmem:[#allocation22_spill] sm:$0xff] %v6443_v0  ;;  %6719 = vst [vmem:[#allocation23_spill] sm:$0xff] %v6447_v27 }
 0x1c4   : > { %v6449_v5 = vpop.f32.mrf.mxu1  ;;  %v6451_v48 = vpop.f32.mrf.mxu0 }
 0x1c5   : > { %6720 = vst [vmem:[#allocation24_spill] sm:$0xff] %v6449_v5  ;;  %6721 = vst [vmem:[#allocation25_spill] sm:$0xff] %v6451_v48 }
 0x1c6   : > { %v5116_v56 = vpop.f32.mrf.mxu1  ;;  %v5164_v53 = vpop.f32.mrf.mxu0 }
 0x1c7   : > { %v2589_v52 = vadd.f32 %v5116_v56, %v6341_v63 }
 0x1c8   : > { %v6454_v38 = vpop.f32.mrf.mxu1  ;;  %v6456_v55 = vpop.f32.mrf.mxu0 }
 0x1c9   : > { %6722 = vst [vmem:[#allocation26_spill] sm:$0xff] %v6456_v55  ;;  %v6458_v23 = vadd.f32 %v5164_v53, %v2589_v52 }
 0x1ca   : > { %v6460_v4 = vpop.f32.mrf.mxu1  ;;  %v6462_v14 = vpop.f32.mrf.mxu0 }
 0x1cb   : > { %6723 = vst [vmem:[#allocation27_spill] sm:$0xff] %v6458_v23  ;;  %6724 = vst [vmem:[#allocation28_spill] sm:$0xff] %v6460_v4 }
 0x1cc   : > { %6725 = vst [vmem:[#allocation29_spill] sm:$0xff] %v6462_v14  ;;  %v6464_v0 = vpop.f32.mrf.mxu1  ;;  %v6466_v27 = vpop.f32.mrf.mxu0 }
 0x1cd   : > { %6726 = vst [vmem:[#allocation30_spill] sm:$0xff] %v6464_v0  ;;  %6727 = vst [vmem:[#allocation31_spill] sm:$0xff] %v6466_v27  ;;  %v2566_v27 = vadd.f32 %v6368_v43, %v6275_v61 }
 0x1ce   : > { %v5120_v5 = vpop.f32.mrf.mxu1  ;;  %v5168_v48 = vpop.f32.mrf.mxu0 }
 0x1cf   : > { %v2593_v19 = vadd.f32 %v5120_v5, %v6353_v46  ;;  %v2564_v5 = vadd.f32 %v6374_v28, %v6278_v29  ;;  %v2567_v29 = vadd.f32 %v6379_v49, %v6284_v21  ;;  %v2570_v28 = vadd.f32 %v6385_v9, %v6287_v34 }
 0x1d0   : > { %v6469_v56 = vpop.f32.mrf.mxu1  ;;  %v6471_v63 = vpop.f32.mrf.mxu0 }
 0x1d1   : > { %6728 = vst [vmem:[#allocation32_spill] sm:$0xff] %v6469_v56  ;;  %6729 = vst [vmem:[#allocation33_spill] sm:$0xff] %v6471_v63  ;;  %v6473_v55 = vadd.f32 %v5168_v48, %v2593_v19  ;;  %v2937_v48 = vadd.f32 %v6370_v26, %v2566_v27  ;;  %v2935_v61 = vadd.f32 %v6376_v33, %v2564_v5 }
 0x1d2   : > { %v6475_v52 = vpop.f32.mrf.mxu1  ;;  %v6477_v53 = vpop.f32.mrf.mxu0  ;;  %v2938_v5 = vadd.f32 %v6381_v47, %v2567_v29  ;;  %v2941_v21 = vadd.f32 %v6387_v6, %v2570_v28  ;;  %v2571_v47 = vadd.f32 %v6394_v30, %v6296_v44 }
 0x1d3   : > { %6730 = vst [vmem:[#allocation34_spill] sm:$0xff] %v6473_v55  ;;  %6731 = vst [vmem:[#allocation35_spill] sm:$0xff] %v6475_v52 }
 0x1d4   : > { %6732 = vst [vmem:[#allocation36_spill] sm:$0xff] %v6477_v53  ;;  %v6479_v23 = vpop.f32.mrf.mxu1  ;;  %v6481_v14 = vpop.f32.mrf.mxu0 }
 0x1d5   : > { %6733 = vst [vmem:[#allocation37_spill] sm:$0xff] %v6479_v23  ;;  %6734 = vst [vmem:[#allocation38_spill] sm:$0xff] %v6481_v14 }
 0x1d6   : > { %v5188_v0 = vpop.f32.mrf.mxu1  ;;  %v5236_v4 = vpop.f32.mrf.mxu0 }
 0x1d7   : > { %v3306_v19 = vadd.f32 %v5188_v0, %v6365_v22 }
 0x1d8   : > { %v3177_v46 = vpop.f32.mrf.mxu1  ;;  %v3547_v63 = vpop.f32.mrf.mxu0 }
 0x1d9   : > { %v3304_v55 = vadd.f32 %v3177_v46, %v6372_v12  ;;  %v3676_v56 = vadd.f32 %v5236_v4, %v3306_v19  ;;  %v2568_v12 = vadd.f32 %v6389_v11, %v6290_v59 }
 0x1da   : > { %v5189_v14 = vpop.f32.mrf.mxu1  ;;  %v5237_v53 = vpop.f32.mrf.mxu0 }
 0x1db   : > { %v3307_v43 = vadd.f32 %v5189_v14, %v2937_v48  ;;  %v3674_v26 = vadd.f32 %v3547_v63, %v3304_v55 }
 0x1dc   : > { %v3180_v23 = vpop.f32.mrf.mxu1  ;;  %v3550_v52 = vpop.f32.mrf.mxu0 }
 0x1dd   : > { %v3677_v27 = vadd.f32 %v5237_v53, %v3307_v43  ;;  %v3305_v22 = vadd.f32 %v3180_v23, %v2935_v61  ;;  %v3968_v48 = vmul.f32 %v3674_v26, %v3674_v26  ;;  %v2939_v23 = vadd.f32 %v6391_v3, %v2568_v12 }
 0x1de   : > { %v5192_v0 = vpop.f32.mrf.mxu1  ;;  %v5240_v46 = vpop.f32.mrf.mxu0  ;;  %v2574_v61 = vadd.f32 %v6400_v51, %v6299_v35 }
 0x1df   : > { %v4523_v33 = vpack.c.bf16 %v3677_v27, %v3676_v56  ;;  %v3675_v14 = vadd.f32 %v3550_v52, %v3305_v22  ;;  %v3310_v49 = vadd.f32 %v5192_v0, %v6383_v7  ;;  %v3970_v7 = vmul.f32 %v3676_v56, %v3676_v56 }
 0x1e0   : > { %v3193_v34 = vpop.f32.mrf.mxu1  ;;  %v3563_v9 = vpop.f32.mrf.mxu0  ;;  %v3971_v43 = vmul.f32 %v3677_v27, %v3677_v27  ;;  %v2942_v0 = vadd.f32 %v6396_v18, %v2571_v47  ;;  %v2575_v47 = vadd.f32 %v6409_v45, %v6308_v40 }
 0x1e1   : > { %4603 = vst [vmem:[%s6504_s22 + $0x8] sm:$0xff] %v4523_v33   ;;  %v4518_v55 = vpack.c.bf16 %v3675_v14, %v3674_v26  ;;  %v3930_v59 = vadd.f32 %v3675_v14, %v3674_v26  ;;  %v3969_v11 = vmul.f32 %v3675_v14, %v3675_v14  ;;  %v3308_v4 = vadd.f32 %v3193_v34, %v2938_v5 }
 0x1e2   : > { %v5193_v6 = vpop.f32.mrf.mxu1  ;;  %v5241_v63 = vpop.f32.mrf.mxu0  ;;  %v3680_v29 = vadd.f32 %v5240_v46, %v3310_v49  ;;  %v2946_v45 = vadd.f32 %v6411_v31, %v2575_v47 }
 0x1e3   : > { %4519 = vst [vmem:[%s6504_s22] sm:$0xff] %v4518_v55   ;;  %v3931_v52 = vadd.f32 %v3930_v59, %v3676_v56  ;;  %v4000_v53 = vadd.f32 %v3969_v11, %v3968_v48  ;;  %v3311_v19 = vadd.f32 %v5193_v6, %v2941_v21  ;;  %v3678_v28 = vadd.f32 %v3563_v9, %v3308_v4 }
 0x1e4   : > { %v3196_v26 = vpop.f32.mrf.mxu1  ;;  %v3566_v22 = vpop.f32.mrf.mxu0  ;;  %v2572_v56 = vadd.f32 %v6404_v20, %v6302_v16  ;;  %v2578_v4 = vadd.f32 %v6415_v37, %v6311_v54  ;;  %v2576_v54 = vadd.f32 %v6419_v1, %v6314_v2 }
 0x1e5   : > { %v4001_v3 = vadd.f32 %v4000_v53, %v3970_v7  ;;  %v3932_v12 = vadd.f32 %v3931_v52, %v3677_v27  ;;  %v3681_v44 = vadd.f32 %v5241_v63, %v3311_v19  ;;  %v3309_v30 = vadd.f32 %v3196_v26, %v2939_v23 }
 0x1e6   : > { %v5196_v33 = vpop.f32.mrf.mxu1  ;;  %v5244_v14 = vpop.f32.mrf.mxu0  ;;  %v3972_v21 = vmul.f32 %v3678_v28, %v3678_v28  ;;  %v2945_v27 = vadd.f32 %v6402_v10, %v2574_v61  ;;  %v2943_v23 = vadd.f32 %v6406_v32, %v2572_v56  ;;  %v3974_v10 = vmul.f32 %v3680_v29, %v3680_v29 }
 0x1e7   : > { %v3933_v5 = vadd.f32 %v3932_v12, %v3678_v28  ;;  %v4002_v35 = vadd.f32 %v4001_v3, %v3971_v43  ;;  %v4533_v51 = vpack.c.bf16 %v3681_v44, %v3680_v29  ;;  %v3679_v46 = vadd.f32 %v3566_v22, %v3309_v30 }
 0x1e8   : > { %v3209_v49 = vpop.f32.mrf.mxu1  ;;  %v3579_v34 = vpop.f32.mrf.mxu0  ;;  %v3314_v48 = vadd.f32 %v5196_v33, %v6398_v15  ;;  %v2949_v3 = vadd.f32 %v6417_v42, %v2578_v4  ;;  %v2947_v1 = vadd.f32 %v6421_v58, %v2576_v54  ;;  %v2579_v42 = vadd.f32 %v6424_v60, %v6320_v8 }
 0x1e9   : > { %v4003_v9 = vadd.f32 %v4002_v35, %v3972_v21  ;;  %4605 = vst [vmem:[%s6504_s22 + $0x18] sm:$0xff] %v4533_v51   ;;  %v3312_v18 = vadd.f32 %v3209_v49, %v2942_v0  ;;  %v4528_v55 = vpack.c.bf16 %v3679_v46, %v3678_v28  ;;  %v3934_v59 = vadd.f32 %v3933_v5, %v3679_v46 }
 0x1ea   : > { %v3973_v16 = vmul.f32 %v3679_v46, %v3679_v46  ;;  %v5197_v20 = vpop.f32.mrf.mxu1  ;;  %v5245_v11 = vpop.f32.mrf.mxu0  ;;  %v3684_v19 = vadd.f32 %v5244_v14, %v3314_v48  ;;  %v3975_v28 = vmul.f32 %v3681_v44, %v3681_v44  ;;  %v2582_v46 = vadd.f32 %v6430_v24, %v6323_v41 }
 0x1eb   : > { %v3315_v6 = vadd.f32 %v5197_v20, %v2945_v27  ;;  %4604 = vst [vmem:[%s6504_s22 + $0x10] sm:$0xff] %v4528_v55   ;;  %v3935_v63 = vadd.f32 %v3934_v59, %v3680_v29  ;;  %v3682_v15 = vadd.f32 %v3579_v34, %v3312_v18  ;;  %v2950_v60 = vadd.f32 %v6426_v62, %v2579_v42  ;;  %v6741_v42 = vld [vmem:[#allocation23_spill] sm:$0xff] }
 0x1ec   : > { %v4004_v7 = vadd.f32 %v4003_v9, %v3973_v16  ;;  %v3212_v52 = vpop.f32.mrf.mxu1  ;;  %v3582_v53 = vpop.f32.mrf.mxu0  ;;  %v3978_v34 = vmul.f32 %v3684_v19, %v3684_v19  ;;  %v2580_v41 = vadd.f32 %v6434_v17, %v6326_v57  ;;  %v2953_v4 = vadd.f32 %v6432_v50, %v2582_v46  ;;  %v6735_v17 = vld [vmem:[#allocation20_spill] sm:$0xff] }
 0x1ed   : > { %v3685_v61 = vadd.f32 %v5245_v11, %v3315_v6  ;;  %v3313_v43 = vadd.f32 %v3212_v52, %v2943_v23  ;;  %v3936_v26 = vadd.f32 %v3935_v63, %v3681_v44  ;;  %v3976_v30 = vmul.f32 %v3682_v15, %v3682_v15 }
 0x1ee   : > { %v4005_v32 = vadd.f32 %v4004_v7, %v3974_v10  ;;  %v5200_v22 = vpop.f32.mrf.mxu1  ;;  %v5248_v40 = vpop.f32.mrf.mxu0 }
 0x1ef   : > { %v4543_v37 = vpack.c.bf16 %v3685_v61, %v3684_v19  ;;  %v3683_v29 = vadd.f32 %v3582_v53, %v3313_v43  ;;  %v3937_v12 = vadd.f32 %v3936_v26, %v3682_v15  ;;  %v3318_v5 = vadd.f32 %v5200_v22, %v6413_v36  ;;  %v6736_v26 = vld [vmem:[#allocation11_spill] sm:$0xff]  ;;  %v6737_v22 = vld [vmem:[#allocation12_spill] sm:$0xff] }
 0x1f0   : > { %v4006_v0 = vadd.f32 %v4005_v32, %v3975_v28  ;;  %v3225_v56 = vpop.f32.mrf.mxu1  ;;  %v3595_v33 = vpop.f32.mrf.mxu0  ;;  %v3979_v20 = vmul.f32 %v3685_v61, %v3685_v61  ;;  %v2951_v32 = vadd.f32 %v6735_v17, %v2580_v41  ;;  %v2583_v50 = vadd.f32 %v6439_v25, %v6736_v26  ;;  %v6744_v41 = vld [vmem:[#allocation14_spill] sm:$0xff] }
 0x1f1   : > { %4607 = vst [vmem:[%s6504_s22 + $0x28] sm:$0xff] %v4543_v37   ;;  %v4538_v14 = vpack.c.bf16 %v3683_v29, %v3682_v15  ;;  %v3977_v44 = vmul.f32 %v3683_v29, %v3683_v29  ;;  %v3316_v21 = vadd.f32 %v3225_v56, %v2946_v45  ;;  %v3938_v35 = vadd.f32 %v3937_v12, %v3683_v29  ;;  %v6747_v26 = vld [vmem:[#allocation26_spill] sm:$0xff] }
 0x1f2   : > { %v4007_v31 = vadd.f32 %v4006_v0, %v3976_v30  ;;  %v5201_v51 = vpop.f32.mrf.mxu1  ;;  %v5249_v2 = vpop.f32.mrf.mxu0  ;;  %v3688_v55 = vadd.f32 %v5248_v40, %v3318_v5  ;;  %v2586_v40 = vadd.f32 %v6445_v39, %v6737_v22  ;;  %v6739_v39 = vld [vmem:[#allocation13_spill] sm:$0xff]  ;;  %v6748_v22 = vld [vmem:[#allocation16_spill] sm:$0xff] }
 0x1f3   : > { %4606 = vst [vmem:[%s6504_s22 + $0x20] sm:$0xff] %v4538_v14   ;;  %v3319_v49 = vadd.f32 %v5201_v51, %v2949_v3  ;;  %v3939_v27 = vadd.f32 %v3938_v35, %v3684_v19  ;;  %v3686_v48 = vadd.f32 %v3595_v33, %v3316_v21  ;;  %v6738_v21 = vld [vmem:[#allocation21_spill] sm:$0xff]  ;;  %v6740_v35 = vld [vmem:[#allocation24_spill] sm:$0xff] }
 0x1f4   : > { %v4008_v9 = vadd.f32 %v4007_v31, %v3977_v44  ;;  %v3228_v36 = vpop.f32.mrf.mxu1  ;;  %v3598_v18 = vpop.f32.mrf.mxu0  ;;  %v3982_v54 = vmul.f32 %v3688_v55, %v3688_v55  ;;  %v2954_v31 = vadd.f32 %v6738_v21, %v2583_v50  ;;  %v2584_v51 = vadd.f32 %v6740_v35, %v6739_v39 }
 0x1f5   : > { %v3689_v59 = vadd.f32 %v5249_v2, %v3319_v49  ;;  %v3317_v16 = vadd.f32 %v3228_v36, %v2947_v1  ;;  %v3940_v11 = vadd.f32 %v3939_v27, %v3685_v61  ;;  %v3980_v10 = vmul.f32 %v3686_v48, %v3686_v48 }
 0x1f6   : > { %v4009_v58 = vadd.f32 %v4008_v9, %v3978_v34  ;;  %v5204_v23 = vpop.f32.mrf.mxu1  ;;  %v5252_v8 = vpop.f32.mrf.mxu0  ;;  %v2957_v46 = vadd.f32 %v6741_v42, %v2586_v40  ;;  %v6749_v40 = vld [vmem:[#allocation30_spill] sm:$0xff]  ;;  %v6754_v42 = vld [vmem:[#allocation32_spill] sm:$0xff] }
 0x1f7   : > { %v4553_v24 = vpack.c.bf16 %v3689_v59, %v3688_v55  ;;  %v3687_v47 = vadd.f32 %v3598_v18, %v3317_v16  ;;  %v3941_v6 = vadd.f32 %v3940_v11, %v3686_v48  ;;  %v3322_v19 = vadd.f32 %v5204_v23, %v6428_v13 }
 0x1f8   : > { %v4010_v63 = vadd.f32 %v4009_v58, %v3979_v20  ;;  %v3241_v7 = vpop.f32.mrf.mxu1  ;;  %v3611_v15 = vpop.f32.mrf.mxu0  ;;  %v3983_v33 = vmul.f32 %v3689_v59, %v3689_v59 }
 0x1f9   : > { %4609 = vst [vmem:[%s6504_s22 + $0x38] sm:$0xff] %v4553_v24   ;;  %v4548_v52 = vpack.c.bf16 %v3687_v47, %v3686_v48  ;;  %v3981_v53 = vmul.f32 %v3687_v47, %v3687_v47  ;;  %v3320_v61 = vadd.f32 %v3241_v7, %v2950_v60  ;;  %v3942_v43 = vadd.f32 %v3941_v6, %v3687_v47  ;;  %v6745_v47 = vld [vmem:[#allocation15_spill] sm:$0xff] }
 0x1fa   : > { %v4011_v62 = vadd.f32 %v4010_v63, %v3980_v10  ;;  %v5205_v28 = vpop.f32.mrf.mxu1  ;;  %v5253_v57 = vpop.f32.mrf.mxu0  ;;  %v3692_v30 = vadd.f32 %v5252_v8, %v3322_v19  ;;  %v6743_v8 = vld [vmem:[#allocation25_spill] sm:$0xff]  ;;  %v2587_v24 = vadd.f32 %v6454_v38, %v6744_v41 }
 0x1fb   : > { %4608 = vst [vmem:[%s6504_s22 + $0x30] sm:$0xff] %v4548_v52   ;;  %v3323_v45 = vadd.f32 %v5205_v28, %v2953_v4  ;;  %v3943_v37 = vadd.f32 %v3942_v43, %v3688_v55  ;;  %v3690_v3 = vadd.f32 %v3611_v15, %v3320_v61  ;;  %v6742_v55 = vld [vmem:[#allocation22_spill] sm:$0xff]  ;;  %v2955_v60 = vadd.f32 %v6743_v8, %v2584_v51  ;;  %v6746_v4 = vld [vmem:[#allocation28_spill] sm:$0xff]  ;;  %v6752_v51 = vld [vmem:[#allocation31_spill] sm:$0xff] }
 0x1fc   : > { %v4012_v29 = vadd.f32 %v4011_v62, %v3981_v53  ;;  %v3244_v13 = vpop.f32.mrf.mxu1  ;;  %v3614_v12 = vpop.f32.mrf.mxu0  ;;  %v2590_v6 = vadd.f32 %v6746_v4, %v6745_v47  ;;  %v3986_v63 = vmul.f32 %v3692_v30, %v3692_v30  ;;  %v2958_v50 = vadd.f32 %v6747_v26, %v2587_v24  ;;  %v6757_v47 = vld [vmem:[#allocation33_spill] sm:$0xff] }
 0x1fd   : > { %v3693_v0 = vadd.f32 %v5253_v57, %v3323_v45  ;;  %v3321_v56 = vadd.f32 %v3244_v13, %v2951_v32  ;;  %v3944_v44 = vadd.f32 %v3943_v37, %v3689_v59  ;;  %v3984_v34 = vmul.f32 %v3690_v3, %v3690_v3 }
 0x1fe   : > { %v4013_v14 = vadd.f32 %v4012_v29, %v3982_v54  ;;  %v5208_v5 = vpop.f32.mrf.mxu1  ;;  %v5256_v25 = vpop.f32.mrf.mxu0  ;;  %v2588_v45 = vadd.f32 %v6749_v40, %v6748_v22  ;;  %v6750_v29 = vld [vmem:[#allocation29_spill] sm:$0xff] }
 0x1ff   : > { %v4563_v2 = vpack.c.bf16 %v3693_v0, %v3692_v30  ;;  %v3691_v1 = vadd.f32 %v3614_v12, %v3321_v56  ;;  %v3945_v49 = vadd.f32 %v3944_v44, %v3690_v3  ;;  %v3326_v59 = vadd.f32 %v5208_v5, %v6742_v55  ;;  %v6751_v44 = vld [vmem:[#allocation27_spill] sm:$0xff] }
 0x200   : > { %v4014_v27 = vadd.f32 %v4013_v14, %v3983_v33  ;;  %v3257_v9 = vpop.f32.mrf.mxu1  ;;  %v3627_v48 = vpop.f32.mrf.mxu0  ;;  %v3987_v28 = vmul.f32 %v3693_v0, %v3693_v0 }
 0x201   : > { %4611 = vst [vmem:[%s6504_s22 + $0x48] sm:$0xff] %v4563_v2   ;;  %v4558_v36 = vpack.c.bf16 %v3691_v1, %v3690_v3  ;;  %v3985_v18 = vmul.f32 %v3691_v1, %v3691_v1  ;;  %v3324_v16 = vadd.f32 %v3257_v9, %v2954_v31  ;;  %v3946_v58 = vadd.f32 %v3945_v49, %v3691_v1  ;;  %v6753_v1 = vld [vmem:[#allocation17_spill] sm:$0xff]  ;;  %v6755_v49 = vld [vmem:[#allocation18_spill] sm:$0xff] }
 0x202   : > { %v4015_v20 = vadd.f32 %v4014_v27, %v3984_v34  ;;  %v5209_v11 = vpop.f32.mrf.mxu1  ;;  %v5257_v23 = vpop.f32.mrf.mxu0  ;;  %v3696_v61 = vadd.f32 %v5256_v25, %v3326_v59  ;;  %v2961_v3 = vadd.f32 %v6750_v29, %v2590_v6  ;;  %v2959_v2 = vadd.f32 %v6752_v51, %v2588_v45  ;;  %v6756_v34 = vld [vmem:[#allocation35_spill] sm:$0xff] }
 0x203   : > { %4610 = vst [vmem:[%s6504_s22 + $0x40] sm:$0xff] %v4558_v36   ;;  %v3327_v10 = vadd.f32 %v5209_v11, %v2957_v46  ;;  %v3947_v7 = vadd.f32 %v3946_v58, %v3692_v30  ;;  %v3694_v52 = vadd.f32 %v3627_v48, %v3324_v16  ;;  %v2591_v46 = vadd.f32 %v6754_v42, %v6753_v1  ;;  %v6758_v6 = vld [vmem:[#allocation19_spill] sm:$0xff] }
 0x204   : > { %v4016_v15 = vadd.f32 %v4015_v20, %v3985_v18  ;;  %v3260_v53 = vpop.f32.mrf.mxu1  ;;  %v3630_v19 = vpop.f32.mrf.mxu0  ;;  %v2594_v27 = vadd.f32 %v6756_v34, %v6755_v49  ;;  %v3990_v48 = vmul.f32 %v3696_v61, %v3696_v61 }
 0x205   : > { %v3697_v62 = vadd.f32 %v5257_v23, %v3327_v10  ;;  %v3325_v43 = vadd.f32 %v3260_v53, %v2955_v60  ;;  %v3948_v17 = vadd.f32 %v3947_v7, %v3693_v0  ;;  %v3988_v12 = vmul.f32 %v3694_v52, %v3694_v52  ;;  %v6759_v10 = vld [vmem:[#allocation37_spill] sm:$0xff] }
 0x206   : > { %v4017_v57 = vadd.f32 %v4016_v15, %v3986_v63  ;;  %v5212_v32 = vpop.f32.mrf.mxu1  ;;  %v5260_v38 = vpop.f32.mrf.mxu0  ;;  %v2962_v4 = vadd.f32 %v6757_v47, %v2591_v46  ;;  %v2592_v63 = vadd.f32 %v6759_v10, %v6758_v6 }
 0x207   : > { %v4573_v54 = vpack.c.bf16 %v3697_v62, %v3696_v61  ;;  %v3695_v37 = vadd.f32 %v3630_v19, %v3325_v43  ;;  %v3949_v13 = vadd.f32 %v3948_v17, %v3694_v52  ;;  %v3330_v5 = vadd.f32 %v5212_v32, %v6751_v44  ;;  %v6761_v32 = vld [vmem:[#allocation34_spill] sm:$0xff] }
 0x208   : > { %v4018_v30 = vadd.f32 %v4017_v57, %v3987_v28  ;;  %v3273_v56 = vpop.f32.mrf.mxu1  ;;  %v3643_v33 = vpop.f32.mrf.mxu0  ;;  %v3991_v23 = vmul.f32 %v3697_v62, %v3697_v62 }
 0x209   : > { %4613 = vst [vmem:[%s6504_s22 + $0x58] sm:$0xff] %v4573_v54   ;;  %v4568_v14 = vpack.c.bf16 %v3695_v37, %v3694_v52  ;;  %v3989_v0 = vmul.f32 %v3695_v37, %v3695_v37  ;;  %v3328_v25 = vadd.f32 %v3273_v56, %v2958_v50  ;;  %v3950_v31 = vadd.f32 %v3949_v13, %v3695_v37  ;;  %v6760_v52 = vld [vmem:[#allocation36_spill] sm:$0xff]  ;;  %v6762_v54 = vld [vmem:[#allocation38_spill] sm:$0xff] }
 0x20a   : > { %v4019_v21 = vadd.f32 %v4018_v30, %v3988_v12  ;;  %v5213_v39 = vpop.f32.mrf.mxu1  ;;  %v5261_v35 = vpop.f32.mrf.mxu0  ;;  %v3700_v20 = vadd.f32 %v5260_v38, %v3330_v5  ;;  %v2965_v53 = vadd.f32 %v6760_v52, %v2594_v27  ;;  %v2963_v37 = vadd.f32 %v6762_v54, %v2592_v63 }
 0x20b   : > { %4612 = vst [vmem:[%s6504_s22 + $0x50] sm:$0xff] %v4568_v14   ;;  %v3331_v9 = vadd.f32 %v5213_v39, %v2961_v3  ;;  %v3951_v36 = vadd.f32 %v3950_v31, %v3696_v61  ;;  %v3698_v55 = vadd.f32 %v3643_v33, %v3328_v25 }
 0x20c   : > { %v4020_v18 = vadd.f32 %v4019_v21, %v3989_v0  ;;  %v3276_v59 = vpop.f32.mrf.mxu1  ;;  %v3646_v16 = vpop.f32.mrf.mxu0  ;;  %v3994_v3 = vmul.f32 %v3700_v20, %v3700_v20 }
 0x20d   : > { %v3701_v58 = vadd.f32 %v5261_v35, %v3331_v9  ;;  %v3329_v11 = vadd.f32 %v3276_v59, %v2959_v2  ;;  %v3952_v60 = vadd.f32 %v3951_v36, %v3697_v62  ;;  %v3992_v61 = vmul.f32 %v3698_v55, %v3698_v55 }
 0x20e   : > { %v4021_v8 = vadd.f32 %v4020_v18, %v3990_v48  ;;  %v5216_v41 = vpop.f32.mrf.mxu1  ;;  %v5264_v24 = vpop.f32.mrf.mxu0 }
 0x20f   : > { %v4583_v7 = vpack.c.bf16 %v3701_v58, %v3700_v20  ;;  %v3699_v15 = vadd.f32 %v3646_v16, %v3329_v11  ;;  %v3953_v19 = vadd.f32 %v3952_v60, %v3698_v55  ;;  %v3334_v38 = vadd.f32 %v5216_v41, %v6761_v32 }
 0x210   : > { %v4022_v43 = vadd.f32 %v4021_v8, %v3991_v23  ;;  %v3289_v28 = vpop.f32.mrf.mxu1  ;;  %v3659_v57 = vpop.f32.mrf.mxu0  ;;  %v3995_v44 = vmul.f32 %v3701_v58, %v3701_v58 }
 0x211   : > { %4615 = vst [vmem:[%s6504_s22 + $0x68] sm:$0xff] %v4583_v7   ;;  %v4578_v17 = vpack.c.bf16 %v3699_v15, %v3698_v55  ;;  %v3993_v62 = vmul.f32 %v3699_v15, %v3699_v15  ;;  %v3332_v26 = vadd.f32 %v3289_v28, %v2962_v4  ;;  %v3954_v22 = vadd.f32 %v3953_v19, %v3699_v15 }
 0x212   : > { %v4023_v50 = vadd.f32 %v4022_v43, %v3992_v61  ;;  %v5217_v40 = vpop.f32.mrf.mxu1  ;;  %v5265_v45 = vpop.f32.mrf.mxu0  ;;  %v3704_v33 = vadd.f32 %v5264_v24, %v3334_v38 }
 0x213   : > { %4614 = vst [vmem:[%s6504_s22 + $0x60] sm:$0xff] %v4578_v17   ;;  %v3335_v29 = vadd.f32 %v5217_v40, %v2965_v53  ;;  %v3955_v13 = vadd.f32 %v3954_v22, %v3700_v20  ;;  %v3702_v30 = vadd.f32 %v3659_v57, %v3332_v26 }
 0x214   : > { %v4024_v12 = vadd.f32 %v4023_v50, %v3993_v62  ;;  %v3292_v56 = vpop.f32.mrf.mxu1  ;;  %v3662_v21 = vpop.f32.mrf.mxu0  ;;  %v3998_v34 = vmul.f32 %v3704_v33, %v3704_v33 }
 0x215   : > { %v3705_v14 = vadd.f32 %v5265_v45, %v3335_v29  ;;  %v3333_v0 = vadd.f32 %v3292_v56, %v2963_v37  ;;  %v3956_v25 = vadd.f32 %v3955_v13, %v3701_v58  ;;  %v3996_v51 = vmul.f32 %v3702_v30, %v3702_v30 }
 0x216   : > { %v4025_v5 = vadd.f32 %v4024_v12, %v3994_v3 }
 0x217   : > { %v4593_v31 = vpack.c.bf16 %v3705_v14, %v3704_v33  ;;  %v3703_v39 = vadd.f32 %v3662_v21, %v3333_v0  ;;  %v3957_v35 = vadd.f32 %v3956_v25, %v3702_v30 }
 0x218   : > { %v4026_v2 = vadd.f32 %v4025_v5, %v3995_v44 }
 0x219   : > { %4617 = vst [vmem:[%s6504_s22 + $0x78] sm:$0xff] %v4593_v31   ;;  %v4588_v1 = vpack.c.bf16 %v3703_v39, %v3702_v30  ;;  %v3997_v42 = vmul.f32 %v3703_v39, %v3703_v39  ;;  %v3958_v49 = vadd.f32 %v3957_v35, %v3703_v39 }
 0x21a   : > { %v4027_v46 = vadd.f32 %v4026_v2, %v3996_v51 }
 0x21b   : > { %4616 = vst [vmem:[%s6504_s22 + $0x70] sm:$0xff] %v4588_v1   ;;  %v3959_v27 = vadd.f32 %v3958_v49, %v3704_v33 }
 0x21c   : > { %v4028_v9 = vadd.f32 %v4027_v46, %v3997_v42 }
 0x21d   : > { %5428 = shalt.err (!%p5425_p3)
}
 0x21e   : > { %s5429_s9 = scalar_lea.hbm %s6586_s29, 2048  ;;  %s5433_s14 = scalar_lea.hbm %s6702_s2, 4096 }
 0x21f   : > { %p5430_p4 = scmp.ne.s32.totalorder %s6586_s29, %s5429_s9  ;;  %p5434_p9 = scmp.lt.s32.totalorder %s6586_s29, %s6702_s2 }
 0x220   : > { %p5435_p10 = scmp.lt.s32.totalorder %s5433_s14, %s5429_s9 }
 0x221   : > { %p5431_p7 = pnand %p5430_p4, %p5603_p5 }
 0x222   : > { %p5436_p11 = por %p5435_p10, %p5434_p9 }
 0x223   : > { %p5432_p8 = pneg %p5431_p7 }
 0x225   : > { %p5437_p12 = pnand %p5436_p11, %p5432_p8 }
 0x227   : > { %5440 = shalt.err (!%p5437_p12)
}
 0x228   : > { %s5534_s28 = smov 64   ;;  %s5535_s11 = smov 4   ;;  %v3999_v48 = vmul.f32 %v3705_v14, %v3705_v14  ;;  %v3960_v36 = vadd.f32 %v3959_v27, %v3705_v14  ;;  %v4029_v18 = vadd.f32 %v4028_v9, %v3998_v34 }
 0x229   : > { %5283 = dma.vmem_to_hbm [thread:$0]  (%p5603_p5), %s6588_s27, 2048, %s6586_s29, %s4039_s30, %s5534_s28, %s5534_s28, %s5535_s11  }
 0x22a   : > { %v3961_v55 = vrot.slane %v3960_v36, 4  ;;  %v4030_v59 = vadd.f32 %v4029_v18, %v3999_v48  ;;  %s4043_s5 = sand.u32 1, %s5584_s19   ;;  %s4442_s6 = sshll.u32 %s5584_s19, 4 }
 0x22b   : > { %s200_s7 = scalar_lea.vmem [#allocation6], %s6488_s13  ;;  %s206_s27 = scalar_lea.vmem [#allocation8], %s6488_s13 }
 0x22c   : > { %v4031_v16 = vrot.slane %v4030_v59, 4  ;;  %v3962_v20 = vadd.f32 %v3961_v55, %v3960_v36  ;;  %s4076_s8 = sshll.u32 %s200_s7, 4  ;;  %s4089_s29 = sshll.u32 %s206_s27, 4  ;;  %s6626_s8 = int_to_ptr.vmem [resolvable:$true] %s4076_s8  ;;  %s6633_s29 = int_to_ptr.vmem [resolvable:$true] %s4089_s29 }
 0x22d   : > { %s6624_s10 = scalar_lea.hbm %s6703_s3, %s4442_s6  ;;  %s6631_s14 = scalar_lea.hbm %s6704_s4, %s4442_s6 }
 0x22e   : > { %v3963_v58 = vrot.slane %v3962_v20, 2  ;;  %v4032_v11 = vadd.f32 %v4031_v16, %v4030_v59  ;;  %s6635_s22 = scalar_lea.sflag [#allocation7], %s4043_s5  ;;  %s5441_s23 = scalar_lea.vmem %s6626_s8, 16 }
 0x22f   : > { %p5442_p13 = scmp.ne.s32.totalorder %s6626_s8, %s5441_s23  ;;  %s5536_s28 = smov [#allocation6]  }
 0x230   : > { %v3964_v23 = vadd.f32 %v3963_v58, %v3962_v20  ;;  %v4033_v8 = vrot.slane %v4032_v11, 2  ;;  %s5445_s11 = sshll.u32 %s5536_s28, 4  ;;  %s5446_s11 = int_to_ptr.vmem [resolvable:$false] %s5445_s11 }
 0x231   : > { %p5443_p0 = pnand %p5442_p13, %p5603_p5  ;;  %s5447_s30 = scalar_lea.vmem %s5446_s11, 32 }
 0x232   : > { %v3965_v60 = vrot.slane %v3964_v23, 1  ;;  %v4034_v41 = vadd.f32 %v4033_v8, %v4032_v11  ;;  %p5448_p2 = scmp.lt.s32.totalorder %s6626_s8, %s5446_s11  ;;  %p5449_p3 = scmp.lt.s32.totalorder %s5447_s30, %s5441_s23 }
 0x233   : > { %p5444_p1 = pneg %p5443_p0 }
 0x234   : > { %v3966_v24 = vadd.f32 %v3965_v60, %v3964_v23  ;;  %v4035_v47 = vrot.slane %v4034_v41, 1  ;;  %p5450_p4 = por %p5449_p3, %p5448_p2 }
 0x236   : > { %3967 = vst [vmem:[%s200_s7] sm:$0x1] %v3966_v24  ;;  %v4036_v4 = vadd.f32 %v4035_v47, %v4034_v41  ;;  %p5451_p7 = pnand %p5450_p4, %p5444_p1 }
 0x238   : > { %5454 = shalt.err (!%p5451_p7)
}
 0x239   : > { %s5455_s5 = scalar_lea.hbm %s6624_s10, 16  ;;  %s5459_s9 = scalar_lea.hbm %s6703_s3, 32 }
 0x23a   : > { %p5456_p8 = scmp.ne.s32.totalorder %s6624_s10, %s5455_s5  ;;  %p5460_p11 = scmp.lt.s32.totalorder %s6624_s10, %s6703_s3 }
 0x23b   : > { %p5461_p12 = scmp.lt.s32.totalorder %s5459_s9, %s5455_s5 }
 0x23c   : > { %p5457_p9 = pnand %p5456_p8, %p5603_p5 }
 0x23d   : > { %p5462_p13 = por %p5461_p12, %p5460_p11 }
 0x23e   : > { %p5458_p10 = pneg %p5457_p9 }
 0x240   : > { %p5463_p0 = pnand %p5462_p13, %p5458_p10 }
 0x242   : > { %5466 = shalt.err (!%p5463_p0)
}
 0x243   : > { %5284 = dma.vmem_to_hbm [thread:$0]  (%p5603_p5), %s6626_s8, 16, %s6624_s10, %s6635_s22   ;;  %4037 = vst [vmem:[%s206_s27] sm:$0x1] %v4036_v4 }
 0x244   : > { %s5467_s23 = scalar_lea.vmem %s6633_s29, 16  ;;  %s5537_s28 = smov [#allocation8]  }
 0x245   : > { %p5468_p1 = scmp.ne.s32.totalorder %s6633_s29, %s5467_s23  ;;  %s5471_s11 = sshll.u32 %s5537_s28, 4  ;;  %s5472_s11 = int_to_ptr.vmem [resolvable:$false] %s5471_s11 }
 0x246   : > { %s5473_s30 = scalar_lea.vmem %s5472_s11, 32  ;;  %p5474_p4 = scmp.lt.s32.totalorder %s6633_s29, %s5472_s11 }
 0x247   : > { %p5469_p2 = pnand %p5468_p1, %p5603_p5  ;;  %p5475_p7 = scmp.lt.s32.totalorder %s5473_s30, %s5467_s23 }
 0x249   : > { %p5470_p3 = pneg %p5469_p2  ;;  %p5476_p8 = por %p5475_p7, %p5474_p4 }
 0x24b   : > { %p5477_p9 = pnand %p5476_p8, %p5470_p3 }
 0x24d   : > { %5480 = shalt.err (!%p5477_p9)
}
 0x24e   : > { %s5481_s13 = scalar_lea.hbm %s6631_s14, 16  ;;  %s5485_s10 = scalar_lea.hbm %s6704_s4, 32 }
 0x24f   : > { %p5482_p10 = scmp.ne.s32.totalorder %s6631_s14, %s5481_s13  ;;  %p5486_p13 = scmp.lt.s32.totalorder %s6631_s14, %s6704_s4 }
 0x250   : > { %p5487_p0 = scmp.lt.s32.totalorder %s5485_s10, %s5481_s13 }
 0x251   : > { %p5483_p11 = pnand %p5482_p10, %p5603_p5 }
 0x252   : > { %p5488_p1 = por %p5487_p0, %p5486_p13 }
 0x253   : > { %p5484_p12 = pneg %p5483_p11 }
 0x255   : > { %p5489_p2 = pnand %p5488_p1, %p5484_p12 }
 0x257   : > { %5492 = shalt.err (!%p5489_p2)
}
 0x258   : > { %5285 = dma.vmem_to_hbm [thread:$0]  (%p5603_p5), %s6633_s29, 16, %s6631_s14, %s6635_s22  }
 0x259 PF: > { %p5299_p3 = scmp.ge.s32.totalorder %s5531_s18, 2  ;;  %s4101_s7 = sand.u32 1, %s5519_s15  }
 0x25a   : > { %s4102_s9 = scalar_lea.sflag [#allocation5], %s4101_s7 }
 0x25b   : > { %p5290_p4 = pnand %p5299_p3, %p5607_p6 }
 0x25d   : > { %p5291_p7 = pneg %p5290_p4 }
 0x25f   : > { %5510 = dma.done.wait (%p5291_p7), %s4102_s9, 2048  }
 0x260   : > { %5512 = vsyncadd (%p5291_p7), %s4102_s9, 4294965248  ;;  %s4110_s19 = sand.u32 1, %s4201_s20  }
 0x261   : > { %s4111_s25 = scalar_lea.sflag [#allocation7], %s4110_s19 }
 0x262   : > { %5514 = dma.done.wait (%p5291_p7), %s4111_s25, 32  }
 0x263   : > { %5516 = vsyncadd (%p5291_p7), %s4111_s25, 4294967264  ;;  %p18_p5 = scmp.ge.s32.totalorder %s5588_s21, 4   ;;  %s6763_s15 = smov %s5523_s16 }
 0x264   : > { %s6764_s16 = smov %s5527_s17  ;;  %s6765_s17 = smov %s5601_s24 }
 0x265   : > { %s6766_s18 = smov %s5588_s21  ;;  %20 = sbr.rel (!%p18_p5) target bundleno = 5 (0x5), region = 105 }
 0x26a   :  { %4123 = vsyncpa [#allocation5], 1 }
 0x26b   :  { %4125 = vsyncpa [#allocation5 + $0x1], 1 }
 0x26c   :  { %4126 = vsyncpa [#allocation7], 1 }
 0x26d   :  { %4128 = vsyncpa [#allocation7 + $0x1], 1 }

</bundles_post_ra>
